<compile_context>
chip_gen: v5e
topology: v5e:2x2
jax: 0.10.0
libtpu: 0.0.40
codegen_flags: <defaults>
</compile_context>

<pallas_src>
import jax
import jax.numpy as jnp
from jax.experimental import pallas as pl
from jax.experimental.pallas import tpu as pltpu


def _discriminator_kernel(x_ref, w1_ref, b1_ref, w2_ref, b2_ref,
                          w3_ref, b3_ref, o_ref):
    # x_ref: (tb, 784) f32    w1: (784, 512) bf16   b1: (1, 512) bf16
    #                         w2: (512, 256) bf16   b2: (1, 256) bf16
    #                         w3: (1, 256)   bf16   b3: (1, 1)   f32 (SMEM)
    # o_ref: (1, 1, tb) f32  (lane-dense output tile)

    # Cast x to bf16 in-register (no wrapper-side cast pass over HBM).
    x = x_ref[...].astype(jnp.bfloat16)

    # Linear(784 -> 512) + LeakyReLU(0.2); Dropout(0.3) == identity (eval).
    # MXU accumulates in f32; the elementwise epilogue runs in bf16 since the
    # activation is truncated to bf16 before the next matmul anyway.
    h1 = jnp.dot(x, w1_ref[...], preferred_element_type=jnp.float32)
    h1 = h1.astype(jnp.bfloat16) + b1_ref[...]
    h1 = jnp.maximum(h1, 0.2 * h1)

    # Linear(512 -> 256) + LeakyReLU(0.2); Dropout(0.3) == identity (eval).
    h2 = jnp.dot(h1, w2_ref[...], preferred_element_type=jnp.float32)
    h2 = h2.astype(jnp.bfloat16) + b2_ref[...]
    h2 = jnp.maximum(h2, 0.2 * h2)

    # Linear(256 -> 1): N=1 would waste 255/256 of the MXU, so use a VPU
    # multiply (exact bf16*bf16 products in f32) + lane reduce on the XLU.
    logits = jnp.sum(h2.astype(jnp.float32) * w3_ref[...], axis=-1) + b3_ref[0, 0]

    # Exact sigmoid (approx reciprocal on (tb,) elements buys nothing).
    probs = 1.0 / (1.0 + jnp.exp(-logits))
    o_ref[...] = probs.reshape(o_ref.shape).astype(o_ref.dtype)


def prepare_params(params):
    """One-time conversion of f32 torch-layout params to kernel layout (do at load time)."""
    w1, b1, w2, b2, w3, b3 = params
    return (
        w1.astype(jnp.bfloat16),                      # (784, 512)
        b1.reshape(1, 512).astype(jnp.bfloat16),      # (1, 512)
        w2.astype(jnp.bfloat16),                      # (512, 256)
        b2.reshape(1, 256).astype(jnp.bfloat16),      # (1, 256)
        w3.reshape(1, 256).astype(jnp.bfloat16),      # (1, 256) row for VPU reduce
        b3.reshape(1, 1).astype(jnp.float32),         # (1, 1) scalar -> SMEM
    )


def discriminator_forward(img, kernel_params, *, block_b=512):
    """img: (B, 1, 28, 28) float32 -> (B, 1) float32 probabilities.

    kernel_params must come from prepare_params() (bf16 weights, reshaped biases).
    """
    w1b, b1b, w2b, b2b, w3b, b3r = kernel_params
    B = img.shape[0]
    x = img.reshape(B, 784)   # matches torch .view(-1, 784); metadata-only reshape

    if B <= block_b:
        # Small batch: a single full-extent tile; no padding pass over x.
        tb, grid_b, b_pad = B, 1, B
    else:
        # Large batch: 512-row tiles -> grid_b >= 2 (both v7x TCs get work).
        tb = block_b
        grid_b = pl.cdiv(B, tb)
        b_pad = grid_b * tb
        if b_pad != B:
            # Ragged large batch: pad (one extra pass over x). Padded rows
            # produce garbage probabilities that are sliced off below.
            # TODO(synk): mask the last partial tile in-kernel instead of padding.
            x = jnp.pad(x, ((0, b_pad - B), (0, 0)))

    # Weights/biases: constant block index -> stay VMEM-resident across steps.
    resident = lambda shape: pl.BlockSpec(shape, lambda i: (0, 0))

    out = pl.pallas_call(
        _discriminator_kernel,
        out_shape=jax.ShapeDtypeStruct((grid_b, 1, tb), jnp.float32),
        grid=(grid_b,),
        in_specs=[
            pl.BlockSpec((tb, 784), lambda i: (i, 0)),          # x: streamed f32 tiles
            resident((784, 512)), resident((1, 512)),            # w1, b1
            resident((512, 256)), resident((1, 256)),            # w2, b2
            resident((1, 256)),                                   # w3 row
            pl.BlockSpec(memory_space=pltpu.MemorySpace.SMEM),    # b3: SMEM scalar
        ],
        out_specs=pl.BlockSpec((1, 1, tb), lambda i: (i, 0, 0)),  # lane-dense output
        compiler_params=pltpu.CompilerParams(
            dimension_semantics=("parallel",),   # megacore sharding on v7x
            vmem_limit_bytes=32 << 20,           # ample headroom on all generations
        ),
    )(x, w1b, b1b, w2b, b2b, w3b, b3r)

    return out.reshape(b_pad)[:B].reshape(B, 1)


def init_params(key):
    """Deterministic init mimicking torch.nn.Linear default (U[-1/sqrt(fan_in), 1/sqrt(fan_in)])."""
    dims = [(784, 512), (512, 256), (256, 1)]
    params = []
    for i, (fan_in, fan_out) in enumerate(dims):
        kw, kb, key = jax.random.split(jax.random.fold_in(key, i), 3)
        bound = 1.0 / jnp.sqrt(float(fan_in))
        w = jax.random.uniform(kw, (fan_in, fan_out), jnp.float32, -bound, bound)
        b = jax.random.uniform(kb, (fan_out,), jnp.float32, -bound, bound)
        params += [w, b]
    return tuple(params)


if __name__ == "__main__":
    key = jax.random.PRNGKey(0)
    k_img, k_par = jax.random.split(key)

    # MNIST-shaped input (NCHW): batch=2, 1 channel, 28x28 -> 784 features.
    B = 2
    img = jax.random.normal(k_img, (B, 1, 28, 28), dtype=jnp.float32)
    params = init_params(k_par)
    kparams = prepare_params(params)   # one-time bf16/layout conversion

    out = jax.block_until_ready(discriminator_forward(img, kparams))
    assert out.shape == (B, 1), out.shape

    w1, b1, w2, b2, w3, b3 = params
    xr = img.reshape(B, 784)
    bf = jnp.bfloat16
    leaky = lambda h: jnp.maximum(h, 0.2 * h)

    # Reference 1: same precision recipe as the kernel (bf16 ops, f32 MXU acc,
    # bf16 epilogue, f32 final reduce + exact sigmoid).
    h1 = leaky(jnp.dot(xr.astype(bf), w1.astype(bf),
                       preferred_element_type=jnp.float32).astype(bf) + b1.astype(bf))
    h2 = leaky(jnp.dot(h1, w2.astype(bf),
                       preferred_element_type=jnp.float32).astype(bf) + b2.astype(bf))
    logit = jnp.sum(h2.astype(jnp.float32)
                    * w3.reshape(1, 256).astype(bf).astype(jnp.float32),
                    axis=-1, keepdims=True) + b3
    ref_recipe = jax.nn.sigmoid(logit)
    assert jnp.allclose(out, ref_recipe, atol=5e-3), (out, ref_recipe)

    # Reference 2: full-f32 eval-mode PyTorch semantics (looser tolerance for bf16 path).
    g1 = leaky(xr @ w1 + b1)
    g2 = leaky(g1 @ w2 + b2)
    ref_f32 = jax.nn.sigmoid(g2 @ w3 + b3)
    assert jnp.allclose(out, ref_f32, atol=3e-2), (out, ref_f32)

    print("KERNEL_OK")
</pallas_src>

<mosaic_0001>
module attributes {stable_mosaic.version = 11 : i64} {
  func.func @_discriminator_kernel(%arg0: i32, %arg1: memref<2x784xf32, #tpu.memory_space<vmem>>, %arg2: memref<784x512xbf16, #tpu.memory_space<vmem>>, %arg3: memref<1x512xbf16, #tpu.memory_space<vmem>>, %arg4: memref<512x256xbf16, #tpu.memory_space<vmem>>, %arg5: memref<1x256xbf16, #tpu.memory_space<vmem>>, %arg6: memref<1x256xbf16, #tpu.memory_space<vmem>>, %arg7: memref<1x1xf32, #tpu.memory_space<smem>>, %arg8: memref<1x1x2xf32, #tpu.memory_space<vmem>>) attributes {dimension_semantics = [#tpu.dimension_semantics<parallel>], iteration_bounds = array<i64: 1>, scalar_prefetch = 0 : i64, scratch_operands = 0 : i64, tpu.core_type = #tpu.core_type<tc>, window_params = [{transform_indices = @transform_0, window_bounds = array<i64: 2, 784>}, {pipeline_mode = #tpu.pipeline_mode<synchronous>, transform_indices = @transform_1, window_bounds = array<i64: 784, 512>}, {pipeline_mode = #tpu.pipeline_mode<synchronous>, transform_indices = @transform_2, window_bounds = array<i64: 1, 512>}, {pipeline_mode = #tpu.pipeline_mode<synchronous>, transform_indices = @transform_3, window_bounds = array<i64: 512, 256>}, {pipeline_mode = #tpu.pipeline_mode<synchronous>, transform_indices = @transform_4, window_bounds = array<i64: 1, 256>}, {pipeline_mode = #tpu.pipeline_mode<synchronous>, transform_indices = @transform_5, window_bounds = array<i64: 1, 256>}, {transform_indices = @transform_6, window_bounds = array<i64: 1, 1>}, {transform_indices = @transform_7, window_bounds = array<i64: 1, 1, 2>}]} {
    %c0 = arith.constant 0 : index
    %c0_0 = arith.constant 0 : index
    %0 = vector.load %arg1[%c0, %c0_0] : memref<2x784xf32, #tpu.memory_space<vmem>>, vector<2x784xf32>
    %1 = arith.truncf %0 : vector<2x784xf32> to vector<2x784xbf16>
    %c0_1 = arith.constant 0 : index
    %c0_2 = arith.constant 0 : index
    %2 = vector.load %arg2[%c0_1, %c0_2] : memref<784x512xbf16, #tpu.memory_space<vmem>>, vector<784x512xbf16>
    %cst = arith.constant dense<0.000000e+00> : vector<2x512xf32>
    %3 = tpu.matmul %1, %2, %cst {dimension_numbers = #tpu.dot_dimension_numbers<[1], [0], [0], [1], [0, 0, 1, 1], [], []>} : vector<2x784xbf16>, vector<784x512xbf16>, vector<2x512xf32> -> vector<2x512xf32>
    %4 = arith.truncf %3 : vector<2x512xf32> to vector<2x512xbf16>
    %c0_3 = arith.constant 0 : index
    %c0_4 = arith.constant 0 : index
    %5 = vector.load %arg3[%c0_3, %c0_4] : memref<1x512xbf16, #tpu.memory_space<vmem>>, vector<1x512xbf16>
    %6 = vector.broadcast %5 : vector<1x512xbf16> to vector<2x512xbf16>
    %7 = arith.addf %4, %6 : vector<2x512xbf16>
    %cst_5 = arith.constant 2.001950e-01 : bf16
    %8 = vector.broadcast %cst_5 : bf16 to vector<2x512xbf16>
    %9 = arith.mulf %8, %7 : vector<2x512xbf16>
    %10 = arith.maximumf %7, %9 : vector<2x512xbf16>
    %c0_6 = arith.constant 0 : index
    %c0_7 = arith.constant 0 : index
    %11 = vector.load %arg4[%c0_6, %c0_7] : memref<512x256xbf16, #tpu.memory_space<vmem>>, vector<512x256xbf16>
    %cst_8 = arith.constant dense<0.000000e+00> : vector<2x256xf32>
    %12 = tpu.matmul %10, %11, %cst_8 {dimension_numbers = #tpu.dot_dimension_numbers<[1], [0], [0], [1], [0, 0, 1, 1], [], []>} : vector<2x512xbf16>, vector<512x256xbf16>, vector<2x256xf32> -> vector<2x256xf32>
    %13 = arith.truncf %12 : vector<2x256xf32> to vector<2x256xbf16>
    %c0_9 = arith.constant 0 : index
    %c0_10 = arith.constant 0 : index
    %14 = vector.load %arg5[%c0_9, %c0_10] : memref<1x256xbf16, #tpu.memory_space<vmem>>, vector<1x256xbf16>
    %15 = vector.broadcast %14 : vector<1x256xbf16> to vector<2x256xbf16>
    %16 = arith.addf %13, %15 : vector<2x256xbf16>
    %cst_11 = arith.constant 2.001950e-01 : bf16
    %17 = vector.broadcast %cst_11 : bf16 to vector<2x256xbf16>
    %18 = arith.mulf %17, %16 : vector<2x256xbf16>
    %19 = arith.maximumf %16, %18 : vector<2x256xbf16>
    %20 = arith.extf %19 : vector<2x256xbf16> to vector<2x256xf32>
    %c0_12 = arith.constant 0 : index
    %c0_13 = arith.constant 0 : index
    %21 = vector.load %arg6[%c0_12, %c0_13] : memref<1x256xbf16, #tpu.memory_space<vmem>>, vector<1x256xbf16>
    %22 = arith.extf %21 : vector<1x256xbf16> to vector<1x256xf32>
    %23 = vector.broadcast %22 : vector<1x256xf32> to vector<2x256xf32>
    %24 = arith.mulf %20, %23 : vector<2x256xf32>
    %cst_14 = arith.constant dense<0.000000e+00> : vector<2xf32>
    %25 = vector.multi_reduction <add>, %24, %cst_14 [1] : vector<2x256xf32> to vector<2xf32>
    %c0_15 = arith.constant 0 : index
    %c0_16 = arith.constant 0 : index
    %26 = memref.load %arg7[%c0_15, %c0_16] : memref<1x1xf32, #tpu.memory_space<smem>>
    %27 = vector.broadcast %26 : f32 to vector<2xf32>
    %28 = arith.addf %25, %27 : vector<2xf32>
    %cst_17 = arith.constant 0.000000e+00 : f32
    %29 = vector.broadcast %cst_17 : f32 to vector<2xf32>
    %30 = arith.subf %29, %28 : vector<2xf32>
    %31 = math.exp %30 : vector<2xf32>
    %cst_18 = arith.constant 1.000000e+00 : f32
    %32 = vector.broadcast %cst_18 : f32 to vector<2xf32>
    %33 = arith.addf %32, %31 : vector<2xf32>
    %cst_19 = arith.constant 1.000000e+00 : f32
    %34 = vector.broadcast %cst_19 : f32 to vector<2xf32>
    %35 = arith.divf %34, %33 : vector<2xf32>
    %36 = vector.shape_cast %35 : vector<2xf32> to vector<1x1x2xf32>
    %c0_20 = arith.constant 0 : index
    %c0_21 = arith.constant 0 : index
    %c0_22 = arith.constant 0 : index
    %37 = vector.load %arg8[%c0_20, %c0_21, %c0_22] : memref<1x1x2xf32, #tpu.memory_space<vmem>>, vector<1x1x2xf32>
    tpu.vector_store %arg8[%c0_20, %c0_21, %c0_22], %36 {strides = array<i32>} : memref<1x1x2xf32, #tpu.memory_space<vmem>>, vector<1x1x2xf32>,
    return
  }
  func.func @transform_0(%arg0: i32) -> (i32, i32) {
    %c0_i32 = arith.constant 0 : i32
    %c0_i32_0 = arith.constant 0 : i32
    return %arg0, %c0_i32 : i32, i32
  }
  func.func @transform_1(%arg0: i32) -> (i32, i32) {
    %c0_i32 = arith.constant 0 : i32
    %c0_i32_0 = arith.constant 0 : i32
    %c0_i32_1 = arith.constant 0 : i32
    return %c0_i32, %c0_i32_0 : i32, i32
  }
  func.func @transform_2(%arg0: i32) -> (i32, i32) {
    %c0_i32 = arith.constant 0 : i32
    %c0_i32_0 = arith.constant 0 : i32
    %c0_i32_1 = arith.constant 0 : i32
    return %c0_i32, %c0_i32_0 : i32, i32
  }
  func.func @transform_3(%arg0: i32) -> (i32, i32) {
    %c0_i32 = arith.constant 0 : i32
    %c0_i32_0 = arith.constant 0 : i32
    %c0_i32_1 = arith.constant 0 : i32
    return %c0_i32, %c0_i32_0 : i32, i32
  }
  func.func @transform_4(%arg0: i32) -> (i32, i32) {
    %c0_i32 = arith.constant 0 : i32
    %c0_i32_0 = arith.constant 0 : i32
    %c0_i32_1 = arith.constant 0 : i32
    return %c0_i32, %c0_i32_0 : i32, i32
  }
  func.func @transform_5(%arg0: i32) -> (i32, i32) {
    %c0_i32 = arith.constant 0 : i32
    %c0_i32_0 = arith.constant 0 : i32
    %c0_i32_1 = arith.constant 0 : i32
    return %c0_i32, %c0_i32_0 : i32, i32
  }
  func.func @transform_6(%arg0: i32) -> (i32, i32) {
    %c0_i32 = arith.constant 0 : i32
    %c0_i32_0 = arith.constant 0 : i32
    %c0_i32_1 = arith.constant 0 : i32
    return %c0_i32, %c0_i32_0 : i32, i32
  }
  func.func @transform_7(%arg0: i32) -> (i32, i32, i32) {
    %c0_i32 = arith.constant 0 : i32
    %c0_i32_0 = arith.constant 0 : i32
    %c0_i32_1 = arith.constant 0 : i32
    return %arg0, %c0_i32, %c0_i32_0 : i32, i32, i32
  }
}

</mosaic_0001>

<bundles_post_ra>
// kernel: tpu_custom_call.1
= control target key start
LH: loop header
LB: loop body
LE: loop exit
PB: predicated region body
PF: predicated region fallthrough
CT: control target
= control target key end

     0   :  { %13 = vsyncpa [#allocation4], 0  ;;  %s3910_s0 = inlined_call_operand.hbm [shape: f32[2,784], index: 0, kind: input, shape index: {}]   ;;  %s3911_s1 = inlined_call_operand.hbm [shape: bf16[784,512], index: 1, kind: input, shape index: {}]   ;;  %s3912_s2 = inlined_call_operand.hbm [shape: bf16[1,512], index: 2, kind: input, shape index: {}]   ;;  %s3913_s3 = inlined_call_operand.hbm [shape: bf16[512,256], index: 3, kind: input, shape index: {}]   ;;  %s3914_s4 = inlined_call_operand.vmem [shape: bf16[1,256], index: 4, kind: input, shape index: {}]   ;;  %s3915_s5 = inlined_call_operand.vmem [shape: bf16[1,256], index: 5, kind: input, shape index: {}]   ;;  %s3916_s6 = inlined_call_operand.<no memory space> [shape: f32[1,1], index: 6, kind: input, shape index: {}]   ;;  %s3917_s7 = inlined_call_operand.hbm [shape: f32[1,1,2], index: 7, kind: output, shape index: {}]  }
   0x1   :  { %14 = vsyncpa [#allocation7], 0 }
   0x2   :  { %15 = vsyncpa [#allocation10], 0  ;;  %s32_s26 = sshll.u32 %s3911_s1, 4  ;;  %s33_s26 = int_to_ptr.hbm [resolvable:$true] %s32_s26 }
   0x3   :  { %16 = vsyncpa [#allocation5], 0  ;;  %s3746_s27 = smov [#allocation6]   ;;  %s22_s8 = sshll.u32 %s3910_s0, 4  ;;  %s23_s8 = int_to_ptr.hbm [resolvable:$true] %s22_s8 }
   0x4   :  { %s34_s28 = sshll.u32 %s3746_s27, 4  ;;  %s3747_s9 = smov 256   ;;  %s35_s28 = int_to_ptr.vmem [resolvable:$true] %s34_s28 }
   0x5   :  { %s3748_s10 = smov 16   ;;  %s3749_s11 = smov [#allocation3]  }
   0x6   :  { %40 = dma.hbm_to_vmem [thread:$0]  %s33_s26, 25088, %s35_s28, [#allocation7], %s3747_s9, %s3747_s9, %s3748_s10  }
   0x7   :  { %s24_s12 = sshll.u32 %s3749_s11, 4  ;;  %s46_s15 = sshll.u32 %s3912_s2, 4  ;;  %s25_s12 = int_to_ptr.vmem [resolvable:$true] %s24_s12  ;;  %s47_s15 = int_to_ptr.hbm [resolvable:$true] %s46_s15 }
   0x8   :  { %27 = dma.hbm_to_vmem [thread:$0]  %s23_s8, 224, %s25_s12, [#allocation4]  }
   0x9   :  { %s56_s17 = sshll.u32 %s3913_s3, 4  ;;  %s3750_s18 = smov [#allocation8]   ;;  %s57_s17 = int_to_ptr.hbm [resolvable:$true] %s56_s17 }
   0xa   :  { %s48_s19 = sshll.u32 %s3750_s18, 4  ;;  %s3751_s0 = smov [#allocation9]   ;;  %s49_s19 = int_to_ptr.vmem [resolvable:$true] %s48_s19 }
   0xb   :  { %51 = dma.hbm_to_vmem [thread:$0]  %s47_s15, 64, %s49_s19, [#allocation7]  }
   0xc   :  { %s58_s20 = sshll.u32 %s3751_s0, 4  ;;  %s3752_s21 = smov 128   ;;  %s59_s20 = int_to_ptr.vmem [resolvable:$true] %s58_s20 }
   0xd   :  { %s3753_s22 = smov 8  }
   0xe   :  { %64 = dma.hbm_to_vmem [thread:$0]  %s57_s17, 8192, %s59_s20, [#allocation10], %s3752_s21, %s3752_s21, %s3753_s22  }
   0xf   :  { %3738 = dma.done.wait [#allocation4], 224  }
  0x10   :  { %3739 = vsyncadd [#allocation4], 4294967072 }
  0x11   :  { %3740 = dma.done.wait [#allocation7], 25152  }
  0x12   :  { %3741 = vsyncadd [#allocation7], 4294942144 }
  0x13   :  { %3742 = dma.done.wait [#allocation10], 8192  }
  0x14   :  { %3743 = vsyncadd [#allocation10], 4294959104  ;;  %v2415_v0 = vld [vmem:[#allocation6 + $0xe0] sm:$0xf]  ;;  %v3375_v1 = vld [vmem:[#allocation6 + $0xec] sm:$0xf0] }
  0x15   :  { %v2543_v2 = vld [vmem:[#allocation6 + $0x1e0] sm:$0xf]  ;;  %v2416_v3 = vor.u32 %v3375_v1, %v2415_v0  ;;  %v3407_v4 = vld [vmem:[#allocation6 + $0x1ec] sm:$0xf0]  ;;  %vm1292_vm0 = vcmask 130048   ;;  %vm2247_vm1 = vcmask 1041408  }
  0x16   :  { %v2671_v5 = vld [vmem:[#allocation6 + $0x2e0] sm:$0xf]  ;;  %v3439_v6 = vld [vmem:[#allocation6 + $0x2ec] sm:$0xf0]  ;;  %v2544_v7 = vor.u32 %v3407_v4, %v2543_v2  ;;  %s2289_s28 = sshll.u32 %s3917_s7, 4  ;;  %vm2280_vm6 = vcmask 8192   ;;  %s2290_s28 = int_to_ptr.hbm [resolvable:$true] %s2289_s28 }
  0x17   :  { %v2672_v8 = vor.u32 %v3439_v6, %v2671_v5  ;;  %v2799_v9 = vld [vmem:[#allocation6 + $0x3e0] sm:$0xf]  ;;  %v3471_v10 = vld [vmem:[#allocation6 + $0x3ec] sm:$0xf0]  ;;  %1296 = vmatpush.bf16.msra.mxu0 %v2416_v3 }
  0x18   :  { %v2399_v11 = vld [vmem:[#allocation6 + $0xc0] sm:$0xf]  ;;  %v2800_v12 = vor.u32 %v3471_v10, %v2799_v9  ;;  %v3371_v13 = vld [vmem:[#allocation6 + $0xcc] sm:$0xf0]  ;;  %1309 = vmatpush.bf16.msra.mxu1 %v2544_v7 }
  0x19   :  { %v2527_v14 = vld [vmem:[#allocation6 + $0x1c0] sm:$0xf]  ;;  %v3403_v15 = vld [vmem:[#allocation6 + $0x1cc] sm:$0xf0]  ;;  %1322 = vmatpush.bf16.msra.mxu2 %v2672_v8  ;;  %v2400_v16 = vor.u32 %v3371_v13, %v2399_v11 }
  0x1a   :  { %v2528_v17 = vor.u32 %v3403_v15, %v2527_v14  ;;  %v2655_v18 = vld [vmem:[#allocation6 + $0x2c0] sm:$0xf]  ;;  %v3435_v19 = vld [vmem:[#allocation6 + $0x2cc] sm:$0xf0]  ;;  %1335 = vmatpush.bf16.msra.mxu3 %v2800_v12 }
  0x1b   :  { %v2783_v20 = vld [vmem:[#allocation6 + $0x3c0] sm:$0xf]  ;;  %v2656_v21 = vor.u32 %v3435_v19, %v2655_v18  ;;  %v3467_v22 = vld [vmem:[#allocation6 + $0x3cc] sm:$0xf0]  ;;  %1297 = vmatpush.bf16.msra.mxu0 %v2400_v16 }
  0x1c   :  { %v2383_v23 = vld [vmem:[#allocation6 + $0xa0] sm:$0xf]  ;;  %v3367_v24 = vld [vmem:[#allocation6 + $0xac] sm:$0xf0]  ;;  %v2784_v25 = vor.u32 %v3467_v22, %v2783_v20  ;;  %1310 = vmatpush.bf16.msra.mxu1 %v2528_v17 }
  0x1d   :  { %v2511_v26 = vld [vmem:[#allocation6 + $0x1a0] sm:$0xf]  ;;  %v3399_v27 = vld [vmem:[#allocation6 + $0x1ac] sm:$0xf0]  ;;  %v2384_v29 = vor.u32 %v3367_v24, %v2383_v23  ;;  %1323 = vmatpush.bf16.msra.mxu2 %v2656_v21 }
  0x1e   :  { %v2639_v28 = vld [vmem:[#allocation6 + $0x2a0] sm:$0xf]  ;;  %v3431_v30 = vld [vmem:[#allocation6 + $0x2ac] sm:$0xf0]  ;;  %v2512_v33 = vor.u32 %v3399_v27, %v2511_v26  ;;  %1336 = vmatpush.bf16.msra.mxu3 %v2784_v25 }
  0x1f   :  { %v2767_v31 = vld [vmem:[#allocation6 + $0x3a0] sm:$0xf]  ;;  %v3463_v32 = vld [vmem:[#allocation6 + $0x3ac] sm:$0xf0]  ;;  %v2640_v34 = vor.u32 %v3431_v30, %v2639_v28  ;;  %1298 = vmatpush.bf16.msra.mxu0 %v2384_v29 }
  0x20   :  { %v2367_v35 = vld [vmem:[#allocation6 + $0x80] sm:$0xf]  ;;  %v3363_v36 = vld [vmem:[#allocation6 + $0x8c] sm:$0xf0]  ;;  %v2768_v38 = vor.u32 %v3463_v32, %v2767_v31  ;;  %1311 = vmatpush.bf16.msra.mxu1 %v2512_v33 }
  0x21   :  { %v2495_v37 = vld [vmem:[#allocation6 + $0x180] sm:$0xf]  ;;  %v3395_v39 = vld [vmem:[#allocation6 + $0x18c] sm:$0xf0]  ;;  %v2368_v44 = vor.u32 %v3363_v36, %v2367_v35  ;;  %1324 = vmatpush.bf16.msra.mxu2 %v2640_v34  ;;  %v3373_v34 = vld [vmem:[#allocation6 + $0xe4] sm:$0xf] }
  0x22   :  { %v2623_v40 = vld [vmem:[#allocation6 + $0x280] sm:$0xf]  ;;  %v3427_v41 = vld [vmem:[#allocation6 + $0x28c] sm:$0xf0]  ;;  %v2496_v45 = vor.u32 %v3395_v39, %v2495_v37  ;;  %1337 = vmatpush.bf16.msra.mxu3 %v2768_v38  ;;  %v2417_v35 = vld [vmem:[#allocation6 + $0xf0] sm:$0xf0] }
  0x23   :  { %v2751_v42 = vld [vmem:[#allocation6 + $0x380] sm:$0xf]  ;;  %v3459_v43 = vld [vmem:[#allocation6 + $0x38c] sm:$0xf0]  ;;  %v2624_v46 = vor.u32 %v3427_v41, %v2623_v40  ;;  %1299 = vmatpush.bf16.msra.mxu0 %v2368_v44  ;;  %v3405_v40 = vld [vmem:[#allocation6 + $0x1e4] sm:$0xf] }
  0x24   :  { %v2351_v47 = vld [vmem:[#allocation6 + $0x60] sm:$0xf]  ;;  %v3359_v48 = vld [vmem:[#allocation6 + $0x6c] sm:$0xf0]  ;;  %v2752_v50 = vor.u32 %v3459_v43, %v2751_v42  ;;  %1312 = vmatpush.bf16.msra.mxu1 %v2496_v45  ;;  %v2545_v41 = vld [vmem:[#allocation6 + $0x1f0] sm:$0xf0] }
  0x25   :  { %v2479_v49 = vld [vmem:[#allocation6 + $0x160] sm:$0xf]  ;;  %v3391_v51 = vld [vmem:[#allocation6 + $0x16c] sm:$0xf0]  ;;  %v2352_v56 = vor.u32 %v3359_v48, %v2351_v47  ;;  %1325 = vmatpush.bf16.msra.mxu2 %v2624_v46  ;;  %v2420_v48 = vor.u32 %v3373_v34, %v2417_v35 }
  0x26   :  { %v2607_v52 = vld [vmem:[#allocation6 + $0x260] sm:$0xf]  ;;  %v3423_v53 = vld [vmem:[#allocation6 + $0x26c] sm:$0xf0]  ;;  %v2480_v57 = vor.u32 %v3391_v51, %v2479_v49  ;;  %1338 = vmatpush.bf16.msra.mxu3 %v2752_v50  ;;  %v3369_v50 = vld [vmem:[#allocation6 + $0xc4] sm:$0xf] }
  0x27   :  { %v2735_v54 = vld [vmem:[#allocation6 + $0x360] sm:$0xf]  ;;  %v3455_v55 = vld [vmem:[#allocation6 + $0x36c] sm:$0xf0]  ;;  %v2608_v58 = vor.u32 %v3423_v53, %v2607_v52  ;;  %1300 = vmatpush.bf16.msra.mxu0 %v2352_v56  ;;  %v2401_v51 = vld [vmem:[#allocation6 + $0xd0] sm:$0xf0] }
  0x28   :  { %v2335_v59 = vld [vmem:[#allocation6 + $0x40] sm:$0xf]  ;;  %v3355_v60 = vld [vmem:[#allocation6 + $0x4c] sm:$0xf0]  ;;  %v2736_v62 = vor.u32 %v3455_v55, %v2735_v54  ;;  %1313 = vmatpush.bf16.msra.mxu1 %v2480_v57 }
  0x29   :  { %v2463_v61 = vld [vmem:[#allocation6 + $0x140] sm:$0xf]  ;;  %v3387_v63 = vld [vmem:[#allocation6 + $0x14c] sm:$0xf0]  ;;  %v2336_v4 = vor.u32 %v3355_v60, %v2335_v59  ;;  %1326 = vmatpush.bf16.msra.mxu2 %v2608_v58  ;;  %v2548_v59 = vor.u32 %v3405_v40, %v2545_v41 }
  0x2a   :  { %v2591_v0 = vld [vmem:[#allocation6 + $0x240] sm:$0xf]  ;;  %v3419_v1 = vld [vmem:[#allocation6 + $0x24c] sm:$0xf0]  ;;  %v2464_v6 = vor.u32 %v3387_v63, %v2463_v61  ;;  %1339 = vmatpush.bf16.msra.mxu3 %v2736_v62  ;;  %v3401_v61 = vld [vmem:[#allocation6 + $0x1c4] sm:$0xf] }
  0x2b   :  { %v2719_v2 = vld [vmem:[#allocation6 + $0x340] sm:$0xf]  ;;  %v3451_v3 = vld [vmem:[#allocation6 + $0x34c] sm:$0xf0]  ;;  %v2592_v7 = vor.u32 %v3419_v1, %v2591_v0  ;;  %1301 = vmatpush.bf16.msra.mxu0 %v2336_v4  ;;  %v2529_v62 = vld [vmem:[#allocation6 + $0x1d0] sm:$0xf0]  ;;  %v2404_v1 = vor.u32 %v3369_v50, %v2401_v51 }
  0x2c   :  { %v2319_v5 = vld [vmem:[#allocation6 + $0x20] sm:$0xf]  ;;  %v3351_v8 = vld [vmem:[#allocation6 + $0x2c] sm:$0xf0]  ;;  %v2720_v11 = vor.u32 %v3451_v3, %v2719_v2  ;;  %1314 = vmatpush.bf16.msra.mxu1 %v2464_v6  ;;  %v3365_v6 = vld [vmem:[#allocation6 + $0xa4] sm:$0xf] }
  0x2d   :  { %v2447_v9 = vld [vmem:[#allocation6 + $0x120] sm:$0xf]  ;;  %v3383_v10 = vld [vmem:[#allocation6 + $0x12c] sm:$0xf0]  ;;  %v2320_v18 = vor.u32 %v3351_v8, %v2319_v5  ;;  %1327 = vmatpush.bf16.msra.mxu2 %v2592_v7  ;;  %v2385_v7 = vld [vmem:[#allocation6 + $0xb0] sm:$0xf0] }
  0x2e   :  { %v2575_v12 = vld [vmem:[#allocation6 + $0x220] sm:$0xf]  ;;  %v3415_v13 = vld [vmem:[#allocation6 + $0x22c] sm:$0xf0]  ;;  %v2448_v22 = vor.u32 %v3383_v10, %v2447_v9  ;;  %1340 = vmatpush.bf16.msra.mxu3 %v2720_v11  ;;  %v2532_v9 = vor.u32 %v3401_v61, %v2529_v62  ;;  %v3397_v11 = vld [vmem:[#allocation6 + $0x1a4] sm:$0xf] }
  0x2f   :  { %v2703_v14 = vld [vmem:[#allocation6 + $0x320] sm:$0xf]  ;;  %v3447_v15 = vld [vmem:[#allocation6 + $0x32c] sm:$0xf0]  ;;  %v2576_v23 = vor.u32 %v3415_v13, %v2575_v12  ;;  %1302 = vmatpush.bf16.msra.mxu0 %v2320_v18  ;;  %v2513_v12 = vld [vmem:[#allocation6 + $0x1b0] sm:$0xf0] }
  0x30   :  { %v2303_v16 = vld [vmem:[#allocation6] sm:$0xf]  ;;  %v3347_v17 = vld [vmem:[#allocation6 + $0xc] sm:$0xf0]  ;;  %v2704_v26 = vor.u32 %v3447_v15, %v2703_v14  ;;  %1315 = vmatpush.bf16.msra.mxu1 %v2448_v22  ;;  %v2388_v14 = vor.u32 %v3365_v6, %v2385_v7  ;;  %v2516_v22 = vor.u32 %v3397_v11, %v2513_v12 }
  0x31   :  { %v2431_v19 = vld [vmem:[#allocation6 + $0x100] sm:$0xf]  ;;  %v3379_v20 = vld [vmem:[#allocation6 + $0x10c] sm:$0xf0]  ;;  %v2304_v33 = vor.u32 %v3347_v17, %v2303_v16  ;;  %1328 = vmatpush.bf16.msra.mxu2 %v2576_v23 }
  0x32   :  { %v88_v21 = vld [vmem:[#allocation3] sm:$0xff]  ;;  %v2559_v24 = vld [vmem:[#allocation6 + $0x200] sm:$0xf]  ;;  %v2432_v37 = vor.u32 %v3379_v20, %v2431_v19  ;;  %1341 = vmatpush.bf16.msra.mxu3 %v2704_v26  ;;  %v3361_v19 = vld [vmem:[#allocation6 + $0x84] sm:$0xf] }
  0x33   :  { %v3411_v25 = vld [vmem:[#allocation6 + $0x20c] sm:$0xf0]  ;;  %92 = vst [vmem:[#allocation1] ss:$4 sm:$0xff] %v88_v21  ;;  %v2687_v27 = vld [vmem:[#allocation6 + $0x300] sm:$0xf]  ;;  %1303 = vmatpush.bf16.msra.mxu0 %v2304_v33 }
  0x34   :  { %v3443_v28 = vld [vmem:[#allocation6 + $0x30c] sm:$0xf0]  ;;  %v2927_v29 = vld [vmem:[#allocation6 + $0x4e0] sm:$0xf]  ;;  %v2560_v38 = vor.u32 %v3411_v25, %v2559_v24  ;;  %1316 = vmatpush.bf16.msra.mxu1 %v2432_v37  ;;  %v2369_v20 = vld [vmem:[#allocation6 + $0x90] sm:$0xf0] }
  0x35   :  { %v3503_v30 = vld [vmem:[#allocation6 + $0x4ec] sm:$0xf0]  ;;  %v3055_v31 = vld [vmem:[#allocation6 + $0x5e0] sm:$0xf]  ;;  %v2688_v42 = vor.u32 %v3443_v28, %v2687_v27  ;;  %v3393_v21 = vld [vmem:[#allocation6 + $0x184] sm:$0xf]  ;;  %v2372_v28 = vor.u32 %v3361_v19, %v2369_v20 }
  0x36   :  { %v3535_v32 = vld [vmem:[#allocation6 + $0x5ec] sm:$0xf0]  ;;  %v3071_v36 = vld [vmem:[#allocation6 + $0x600] sm:$0xf]  ;;  %v2928_v43 = vor.u32 %v3503_v30, %v2927_v29  ;;  %1329 = vmatpush.bf16.msra.mxu2 %v2560_v38  ;;  %v2497_v24 = vld [vmem:[#allocation6 + $0x190] sm:$0xf0] }
  0x37   :  { %v3539_v39 = vld [vmem:[#allocation6 + $0x60c] sm:$0xf0]  ;;  %v2911_v44 = vld [vmem:[#allocation6 + $0x4c0] sm:$0xf]  ;;  %v3056_v47 = vor.u32 %v3535_v32, %v3055_v31  ;;  %1342 = vmatpush.bf16.msra.mxu3 %v2688_v42  ;;  %v89_v31 = vld [vmem:[#allocation3 + $0x8] sm:$0x3f]  ;;  %v2500_v34 = vor.u32 %v3393_v21, %v2497_v24 }
  0x38   :  { %v3499_v45 = vld [vmem:[#allocation6 + $0x4cc] sm:$0xf0]  ;;  %v3039_v46 = vld [vmem:[#allocation6 + $0x5c0] sm:$0xf]  ;;  %v3072_v55 = vor.u32 %v3539_v39, %v3071_v36  ;;  %1348 = vmatpush.bf16.msrb.mxu0 %v2928_v43  ;;  %v3357_v32 = vld [vmem:[#allocation6 + $0x64] sm:$0xf] }
  0x39   :  { %v3531_v49 = vld [vmem:[#allocation6 + $0x5cc] sm:$0xf0]  ;;  %v2912_v60 = vor.u32 %v3499_v45, %v2911_v44  ;;  %1361 = vmatpush.bf16.msrb.mxu1 %v3056_v47  ;;  %v2895_v2 = vld [vmem:[#allocation6 + $0x4a0] sm:$0xf]  ;;  %v2353_v33 = vld [vmem:[#allocation6 + $0x70] sm:$0xf0] }
  0x3a   :  { %v97_v52 = vld.sshfl [vmem:[#allocation1 + $0x10] sm:$0xff pattern:$0x73625140]  ;;  %v98_v53 = vld.sshfl [vmem:[#allocation1 + $0x18] sm:$0xff pattern:$0x73625140]  ;;  %v3040_v0 = vor.u32 %v3531_v49, %v3039_v46  ;;  %1381 = vmatpush.bf16.msrb.mxu2 %v3072_v55  ;;  %v2356_v39 = vor.u32 %v3357_v32, %v2353_v33 }
  0x3b   :  { %v3807_v54 = vpack.c.bf16 %v97_v52, %v97_v52  ;;  %v3809_v56 = vpack.c.bf16 %v98_v53, %v98_v53  ;;  %v95_v57 = vld.sshfl [vmem:[#allocation1] sm:$0xff pattern:$0x73625140]  ;;  %v96_v58 = vld.sshfl [vmem:[#allocation1 + $0x8] sm:$0xff pattern:$0x73625140]  ;;  %1387 = vmatpush.bf16.msrb.mxu3 %v2420_v48 }
  0x3c   :  { %v3811_v63 = vpack.c.bf16 %v95_v57, %v95_v57  ;;  %v3495_v3 = vld [vmem:[#allocation6 + $0x4ac] sm:$0xf0]  ;;  %v3023_v4 = vld [vmem:[#allocation6 + $0x5a0] sm:$0xf]  ;;  %v3815_v8 = vpack.c.bf16 %v96_v58, %v96_v58  ;;  %1349 = vmatpush.bf16.msrb.mxu0 %v2912_v60  ;;  %94 = vst [vmem:[#allocation1 + $0x20] ss:$4 sm:$0xff] %v89_v31 }
  0x3d   :  { %1330 = vmatmul.bf16.vlgmr.msra.gmra.mxu2 %v3807_v54  ;;  %v3527_v5 = vld [vmem:[#allocation6 + $0x5ac] sm:$0xf0]  ;;  %1343 = vmatmul.bf16.vlgmr.msra.gmra.mxu3 %v3809_v56  ;;  %v2896_v10 = vor.u32 %v3495_v3, %v2895_v2  ;;  %v2879_v15 = vld [vmem:[#allocation6 + $0x480] sm:$0xf]  ;;  %v3389_v36 = vld [vmem:[#allocation6 + $0x164] sm:$0xf] }
  0x3e   :  { %1304 = vmatmul.bf16.vlgmr.msra.gmra.mxu0 %v3811_v63  ;;  %1400 = vmatpush.bf16.msra.mxu2 %v2548_v59  ;;  %v3024_v13 = vor.u32 %v3527_v5, %v3023_v4  ;;  %v3491_v16 = vld [vmem:[#allocation6 + $0x48c] sm:$0xf0]  ;;  %v3007_v17 = vld [vmem:[#allocation6 + $0x580] sm:$0xf]  ;;  %v2481_v37 = vld [vmem:[#allocation6 + $0x170] sm:$0xf0] }
  0x3f   :  { %1362 = vmatpush.bf16.msrb.mxu1 %v3040_v0  ;;  %1388 = vmatpush.bf16.msrb.mxu3 %v2404_v1  ;;  %v3523_v18 = vld [vmem:[#allocation6 + $0x58c] sm:$0xf0]  ;;  %v2880_v23 = vor.u32 %v3491_v16, %v2879_v15  ;;  %v2863_v25 = vld [vmem:[#allocation6 + $0x460] sm:$0xf]  ;;  %v3353_v44 = vld [vmem:[#allocation6 + $0x44] sm:$0xf]  ;;  %v2484_v50 = vor.u32 %v3389_v36, %v2481_v37 }
  0x40   :  { %1317 = vmatmul.bf16.vlgmr.msra.gmra.mxu1 %v3815_v8  ;;  %1350 = vmatpush.bf16.msrb.mxu0 %v2896_v10  ;;  %v3487_v26 = vld [vmem:[#allocation6 + $0x46c] sm:$0xf0]  ;;  %v3008_v27 = vor.u32 %v3523_v18, %v3007_v17  ;;  %v2991_v29 = vld [vmem:[#allocation6 + $0x560] sm:$0xf]  ;;  %v2337_v45 = vld [vmem:[#allocation6 + $0x50] sm:$0xf0] }
  0x41   :  { %v3519_v30 = vld [vmem:[#allocation6 + $0x56c] sm:$0xf0]  ;;  %v2864_v35 = vor.u32 %v3487_v26, %v2863_v25  ;;  %v2847_v40 = vld [vmem:[#allocation6 + $0x440] sm:$0xf]  ;;  %v3385_v46 = vld [vmem:[#allocation6 + $0x144] sm:$0xf]  ;;  %v2340_v59 = vor.u32 %v3353_v44, %v2337_v45 }
  0x42   :  { %1401 = vmatpush.bf16.msra.mxu2 %v2532_v9  ;;  %v2992_v38 = vor.u32 %v3519_v30, %v2991_v29  ;;  %v3483_v41 = vld [vmem:[#allocation6 + $0x44c] sm:$0xf0]  ;;  %v2975_v42 = vld [vmem:[#allocation6 + $0x540] sm:$0xf]  ;;  %v2465_v47 = vld [vmem:[#allocation6 + $0x150] sm:$0xf0] }
  0x43   :  { %1363 = vmatpush.bf16.msrb.mxu1 %v3024_v13  ;;  %1389 = vmatpush.bf16.msrb.mxu3 %v2388_v14  ;;  %v3515_v43 = vld [vmem:[#allocation6 + $0x54c] sm:$0xf0]  ;;  %v2831_v48 = vld [vmem:[#allocation6 + $0x420] sm:$0xf]  ;;  %v2848_v51 = vor.u32 %v3483_v41, %v2847_v40  ;;  %v3349_v55 = vld [vmem:[#allocation6 + $0x24] sm:$0xf]  ;;  %v2468_v2 = vor.u32 %v3385_v46, %v2465_v47 }
  0x44   :  { %1351 = vmatpush.bf16.msrb.mxu0 %v2880_v23  ;;  %v3479_v49 = vld [vmem:[#allocation6 + $0x42c] sm:$0xf0]  ;;  %v2959_v52 = vld [vmem:[#allocation6 + $0x520] sm:$0xf]  ;;  %v2976_v58 = vor.u32 %v3515_v43, %v2975_v42  ;;  %v2321_v60 = vld [vmem:[#allocation6 + $0x30] sm:$0xf0] }
  0x45   :  { %v3511_v53 = vld [vmem:[#allocation6 + $0x52c] sm:$0xf0]  ;;  %v1662_v57 = vld [vmem:[#allocation8] sm:$0xf]  ;;  %v2832_v3 = vor.u32 %v3479_v49, %v2831_v48  ;;  %v3381_v4 = vld [vmem:[#allocation6 + $0x124] sm:$0xf]  ;;  %v2324_v9 = vor.u32 %v3349_v55, %v2321_v60 }
  0x46   :  { %1402 = vmatpush.bf16.msra.mxu2 %v2516_v22  ;;  %v101_v61 = vld.sshfl [vmem:[#allocation1 + $0x30] sm:$0xff pattern:$0x73625140]  ;;  %v99_v0 = vld.sshfl [vmem:[#allocation1 + $0x20] sm:$0xff pattern:$0x73625140]  ;;  %v2960_v7 = vor.u32 %v3511_v53, %v2959_v52 }
  0x47   :  { %1364 = vmatpush.bf16.msrb.mxu1 %v3008_v27  ;;  %1390 = vmatpush.bf16.msrb.mxu3 %v2372_v28  ;;  %v3819_v62 = vpack.c.bf16 %v101_v61, %v101_v61  ;;  %v100_v1 = vld.sshfl [vmem:[#allocation1 + $0x28] sm:$0xff pattern:$0x73625140]  ;;  %v2815_v6 = vld [vmem:[#allocation6 + $0x400] sm:$0xf]  ;;  %v3823_v33 = vpack.c.bf16 %v99_v0, %v99_v0 }
  0x48   :  { %1352 = vmatpush.bf16.msrb.mxu0 %v2864_v35  ;;  %1664 = vst [vmem:[#allocation1] ss:$9 sm:$0xff] %v1662_v57  ;;  %v2449_v5 = vld [vmem:[#allocation6 + $0x130] sm:$0xf0]  ;;  %v3475_v10 = vld [vmem:[#allocation6 + $0x40c] sm:$0xf0] }
  0x49   :  { %v2943_v11 = vld [vmem:[#allocation6 + $0x500] sm:$0xf]  ;;  %v3507_v12 = vld [vmem:[#allocation6 + $0x50c] sm:$0xf0]  ;;  %v3345_v13 = vld [vmem:[#allocation6 + $0x4] sm:$0xf]  ;;  %v2452_v19 = vor.u32 %v3381_v4, %v2449_v5  ;;  %v2816_v20 = vor.u32 %v3475_v10, %v2815_v6 }
  0x4a   :  { %1403 = vmatpush.bf16.msra.mxu2 %v2500_v34  ;;  %v2305_v14 = vld [vmem:[#allocation6 + $0x10] sm:$0xf0]  ;;  %v3437_v15 = vld [vmem:[#allocation6 + $0x2e4] sm:$0xf]  ;;  %v2944_v23 = vor.u32 %v3507_v12, %v2943_v11 }
  0x4b   :  { %1365 = vmatpush.bf16.msrb.mxu1 %v2992_v38  ;;  %1391 = vmatpush.bf16.msrb.mxu3 %v2356_v39  ;;  %v2673_v16 = vld [vmem:[#allocation6 + $0x2f0] sm:$0xf0]  ;;  %v3469_v17 = vld [vmem:[#allocation6 + $0x3e4] sm:$0xf]  ;;  %v2308_v24 = vor.u32 %v3345_v13, %v2305_v14  ;;  %v3825_v38 = vpack.c.bf16 %v100_v1, %v100_v1 }
  0x4c   :  { %1353 = vmatpush.bf16.msrb.mxu0 %v2848_v51  ;;  %v2801_v18 = vld [vmem:[#allocation6 + $0x3f0] sm:$0xf0]  ;;  %v3501_v21 = vld [vmem:[#allocation6 + $0x4e4] sm:$0xf]  ;;  %v2676_v27 = vor.u32 %v3437_v15, %v2673_v16 }
  0x4d   :  { %3085 = vmatmul.msk.bf16.vlgmr.msrb.gmra.mxu2 %vm1292_vm0, %v3819_v62  ;;  %v2929_v22 = vld [vmem:[#allocation6 + $0x4f0] sm:$0xf0]  ;;  %v3377_v25 = vld [vmem:[#allocation6 + $0x104] sm:$0xf]  ;;  %v2804_v28 = vor.u32 %v3469_v17, %v2801_v18 }
  0x4e   :  { %1404 = vmatpush.bf16.msra.mxu2 %v2484_v50  ;;  %v2433_v26 = vld [vmem:[#allocation6 + $0x110] sm:$0xf0]  ;;  %v3533_v29 = vld [vmem:[#allocation6 + $0x5e4] sm:$0xf]  ;;  %v2932_v32 = vor.u32 %v3501_v21, %v2929_v22 }
  0x4f   :  { %1366 = vmatpush.bf16.msrb.mxu1 %v2976_v58  ;;  %1392 = vmatpush.bf16.msrb.mxu3 %v2340_v59  ;;  %v3057_v30 = vld [vmem:[#allocation6 + $0x5f0] sm:$0xf0]  ;;  %v3433_v31 = vld [vmem:[#allocation6 + $0x2c4] sm:$0xf]  ;;  %v2436_v37 = vor.u32 %v3377_v25, %v2433_v26 }
  0x50   :  { %1354 = vmatpush.bf16.msrb.mxu0 %v2832_v3  ;;  %v2657_v34 = vld [vmem:[#allocation6 + $0x2d0] sm:$0xf0]  ;;  %v3465_v35 = vld [vmem:[#allocation6 + $0x3c4] sm:$0xf]  ;;  %v3060_v41 = vor.u32 %v3533_v29, %v3057_v30 }
  0x51   :  { %v2785_v36 = vld [vmem:[#allocation6 + $0x3d0] sm:$0xf0]  ;;  %v3497_v39 = vld [vmem:[#allocation6 + $0x4c4] sm:$0xf]  ;;  %v2660_v42 = vor.u32 %v3433_v31, %v2657_v34 }
  0x52   :  { %1405 = vmatpush.bf16.msra.mxu2 %v2468_v2  ;;  %v2913_v40 = vld [vmem:[#allocation6 + $0x4d0] sm:$0xf0]  ;;  %v2788_v43 = vor.u32 %v3465_v35, %v2785_v36  ;;  %v3529_v44 = vld [vmem:[#allocation6 + $0x5c4] sm:$0xf] }
  0x53   :  { %1367 = vmatpush.bf16.msrb.mxu1 %v2960_v7  ;;  %1393 = vmatpush.bf16.msrb.mxu3 %v2324_v9  ;;  %v3041_v45 = vld [vmem:[#allocation6 + $0x5d0] sm:$0xf0]  ;;  %v3429_v46 = vld [vmem:[#allocation6 + $0x2a4] sm:$0xf]  ;;  %v2916_v47 = vor.u32 %v3497_v39, %v2913_v40 }
  0x54   :  { %1355 = vmatpush.bf16.msrb.mxu0 %v2816_v20  ;;  %v2641_v48 = vld [vmem:[#allocation6 + $0x2b0] sm:$0xf0]  ;;  %v3461_v49 = vld [vmem:[#allocation6 + $0x3a4] sm:$0xf]  ;;  %v3044_v53 = vor.u32 %v3529_v44, %v3041_v45 }
  0x55   :  { %v2769_v50 = vld [vmem:[#allocation6 + $0x3b0] sm:$0xf0]  ;;  %v3493_v51 = vld [vmem:[#allocation6 + $0x4a4] sm:$0xf]  ;;  %v2644_v55 = vor.u32 %v3429_v46, %v2641_v48 }
  0x56   :  { %1406 = vmatpush.bf16.msra.mxu2 %v2452_v19  ;;  %v2897_v52 = vld [vmem:[#allocation6 + $0x4b0] sm:$0xf0]  ;;  %v2772_v57 = vor.u32 %v3461_v49, %v2769_v50  ;;  %v3525_v58 = vld [vmem:[#allocation6 + $0x5a4] sm:$0xf] }
  0x57   :  { %1368 = vmatpush.bf16.msrb.mxu1 %v2944_v23  ;;  %1394 = vmatpush.bf16.msrb.mxu3 %v2308_v24  ;;  %v3025_v59 = vld [vmem:[#allocation6 + $0x5b0] sm:$0xf0]  ;;  %v3425_v60 = vld [vmem:[#allocation6 + $0x284] sm:$0xf]  ;;  %v2900_v61 = vor.u32 %v3493_v51, %v2897_v52 }
  0x58   :  { %1413 = vmatpush.bf16.msra.mxu0 %v2676_v27  ;;  %v2625_v0 = vld [vmem:[#allocation6 + $0x290] sm:$0xf0]  ;;  %v3457_v1 = vld [vmem:[#allocation6 + $0x384] sm:$0xf]  ;;  %v3028_v5 = vor.u32 %v3525_v58, %v3025_v59  ;;  %v2423_v58 = vld [vmem:[#allocation6 + $0xe8] sm:$0xf] }
  0x59   :  { %1356 = vmatmul.bf16.vlgmr.msrb.gmra.mxu0 %v3823_v33  ;;  %v2753_v2 = vld [vmem:[#allocation6 + $0x390] sm:$0xf0]  ;;  %v3489_v3 = vld [vmem:[#allocation6 + $0x484] sm:$0xf]  ;;  %v2628_v6 = vor.u32 %v3425_v60, %v2625_v0  ;;  %v3376_v59 = vld [vmem:[#allocation6 + $0xf4] sm:$0xf0] }
  0x5a   :  { %1407 = vmatpush.bf16.msra.mxu2 %v2436_v37  ;;  %1369 = vmatmul.bf16.vlgmr.msrb.gmra.mxu1 %v3825_v38  ;;  %v2881_v4 = vld [vmem:[#allocation6 + $0x490] sm:$0xf0]  ;;  %v2756_v7 = vor.u32 %v3457_v1, %v2753_v2  ;;  %v3521_v9 = vld [vmem:[#allocation6 + $0x584] sm:$0xf]  ;;  %v2679_v1 = vld [vmem:[#allocation6 + $0x2e8] sm:$0xf] }
  0x5b   :  { %1426 = vmatpush.bf16.msra.mxu1 %v2804_v28  ;;  %1439 = vmatpush.bf16.msra.mxu3 %v2932_v32  ;;  %v3009_v10 = vld [vmem:[#allocation6 + $0x590] sm:$0xf0]  ;;  %v3421_v11 = vld [vmem:[#allocation6 + $0x264] sm:$0xf]  ;;  %v2884_v12 = vor.u32 %v3489_v3, %v2881_v4  ;;  %v3440_v2 = vld [vmem:[#allocation6 + $0x2f4] sm:$0xf0] }
  0x5c   :  { %1395 = vmatmul.bf16.vlgmr.msrb.gmra.mxu3 %v3811_v63  ;;  %1414 = vmatpush.bf16.msra.mxu0 %v2660_v42  ;;  %v2609_v13 = vld [vmem:[#allocation6 + $0x270] sm:$0xf0]  ;;  %v3453_v14 = vld [vmem:[#allocation6 + $0x364] sm:$0xf]  ;;  %v3012_v18 = vor.u32 %v3521_v9, %v3009_v10  ;;  %v2424_v9 = vor.u32 %v3376_v59, %v2423_v58  ;;  %v2807_v10 = vld [vmem:[#allocation6 + $0x3e8] sm:$0xf] }
  0x5d   :  { %v2737_v15 = vld [vmem:[#allocation6 + $0x370] sm:$0xf0]  ;;  %1408 = vmatmul.bf16.vlgmr.msra.gmra.mxu2 %v3815_v8  ;;  %v3485_v16 = vld [vmem:[#allocation6 + $0x464] sm:$0xf]  ;;  %v2612_v19 = vor.u32 %v3421_v11, %v2609_v13  ;;  %v3472_v11 = vld [vmem:[#allocation6 + $0x3f4] sm:$0xf0] }
  0x5e   :  { %1452 = vmatpush.bf16.msrb.mxu2 %v3060_v41  ;;  %v2865_v17 = vld [vmem:[#allocation6 + $0x470] sm:$0xf0]  ;;  %v2740_v20 = vor.u32 %v3453_v14, %v2737_v15  ;;  %v3517_v21 = vld [vmem:[#allocation6 + $0x564] sm:$0xf]  ;;  %v2551_v13 = vld [vmem:[#allocation6 + $0x1e8] sm:$0xf]  ;;  %v2680_v15 = vor.u32 %v3440_v2, %v2679_v1 }
  0x5f   :  { %1427 = vmatpush.bf16.msra.mxu1 %v2788_v43  ;;  %1440 = vmatpush.bf16.msra.mxu3 %v2916_v47  ;;  %v2993_v22 = vld [vmem:[#allocation6 + $0x570] sm:$0xf0]  ;;  %v3417_v23 = vld [vmem:[#allocation6 + $0x244] sm:$0xf]  ;;  %v2868_v24 = vor.u32 %v3485_v16, %v2865_v17  ;;  %v3408_v14 = vld [vmem:[#allocation6 + $0x1f4] sm:$0xf0] }
  0x60   :  { %1415 = vmatpush.bf16.msra.mxu0 %v2644_v55  ;;  %v2593_v25 = vld [vmem:[#allocation6 + $0x250] sm:$0xf0]  ;;  %v3449_v26 = vld [vmem:[#allocation6 + $0x344] sm:$0xf]  ;;  %v2996_v30 = vor.u32 %v3517_v21, %v2993_v22  ;;  %v2407_v17 = vld [vmem:[#allocation6 + $0xc8] sm:$0xf]  ;;  %v2552_v22 = vor.u32 %v3408_v14, %v2551_v13 }
  0x61   :  { %v2721_v27 = vld [vmem:[#allocation6 + $0x350] sm:$0xf0]  ;;  %v3481_v28 = vld [vmem:[#allocation6 + $0x444] sm:$0xf]  ;;  %v2596_v31 = vor.u32 %v3417_v23, %v2593_v25  ;;  %v3436_v21 = vld [vmem:[#allocation6 + $0x2d4] sm:$0xf0] }
  0x62   :  { %1453 = vmatpush.bf16.msrb.mxu2 %v3044_v53  ;;  %v2849_v29 = vld [vmem:[#allocation6 + $0x450] sm:$0xf0]  ;;  %v2724_v32 = vor.u32 %v3449_v26, %v2721_v27  ;;  %v3513_v34 = vld [vmem:[#allocation6 + $0x544] sm:$0xf]  ;;  %v2791_v23 = vld [vmem:[#allocation6 + $0x3c8] sm:$0xf] }
  0x63   :  { %1428 = vmatpush.bf16.msra.mxu1 %v2772_v57  ;;  %1441 = vmatpush.bf16.msra.mxu3 %v2900_v61  ;;  %v2977_v35 = vld [vmem:[#allocation6 + $0x550] sm:$0xf0]  ;;  %v3413_v36 = vld [vmem:[#allocation6 + $0x224] sm:$0xf]  ;;  %v2852_v37 = vor.u32 %v3481_v28, %v2849_v29  ;;  %v2535_v26 = vld [vmem:[#allocation6 + $0x1c8] sm:$0xf] }
  0x64   :  { %1416 = vmatpush.bf16.msra.mxu0 %v2628_v6  ;;  %v2577_v39 = vld [vmem:[#allocation6 + $0x230] sm:$0xf0]  ;;  %v3445_v40 = vld [vmem:[#allocation6 + $0x324] sm:$0xf]  ;;  %v2980_v44 = vor.u32 %v3513_v34, %v2977_v35  ;;  %v3404_v27 = vld [vmem:[#allocation6 + $0x1d4] sm:$0xf0] }
  0x65   :  { %v2705_v41 = vld [vmem:[#allocation6 + $0x330] sm:$0xf0]  ;;  %v3477_v42 = vld [vmem:[#allocation6 + $0x424] sm:$0xf]  ;;  %v2580_v47 = vor.u32 %v3413_v36, %v2577_v39  ;;  %v2391_v29 = vld [vmem:[#allocation6 + $0xa8] sm:$0xf]  ;;  %v2536_v35 = vor.u32 %v3404_v27, %v2535_v26 }
  0x66   :  { %1454 = vmatpush.bf16.msrb.mxu2 %v3028_v5  ;;  %v2833_v43 = vld [vmem:[#allocation6 + $0x430] sm:$0xf0]  ;;  %v3509_v45 = vld [vmem:[#allocation6 + $0x524] sm:$0xf]  ;;  %v2708_v48 = vor.u32 %v3445_v40, %v2705_v41  ;;  %v3432_v34 = vld [vmem:[#allocation6 + $0x2b4] sm:$0xf0] }
  0x67   :  { %1429 = vmatpush.bf16.msra.mxu1 %v2756_v7  ;;  %1442 = vmatpush.bf16.msra.mxu3 %v2884_v12  ;;  %v2961_v46 = vld [vmem:[#allocation6 + $0x530] sm:$0xf0]  ;;  %v3409_v49 = vld [vmem:[#allocation6 + $0x204] sm:$0xf]  ;;  %v2836_v52 = vor.u32 %v3477_v42, %v2833_v43  ;;  %v2775_v36 = vld [vmem:[#allocation6 + $0x3a8] sm:$0xf] }
  0x68   :  { %1417 = vmatpush.bf16.msra.mxu0 %v2612_v19  ;;  %v2561_v50 = vld [vmem:[#allocation6 + $0x210] sm:$0xf0]  ;;  %v3441_v51 = vld [vmem:[#allocation6 + $0x304] sm:$0xf]  ;;  %v2964_v61 = vor.u32 %v3509_v45, %v2961_v46  ;;  %v2808_v19 = vor.u32 %v3472_v11, %v2807_v10  ;;  %v2519_v40 = vld [vmem:[#allocation6 + $0x1a8] sm:$0xf] }
  0x69   :  { %v2689_v53 = vld [vmem:[#allocation6 + $0x310] sm:$0xf0]  ;;  %v3473_v55 = vld [vmem:[#allocation6 + $0x404] sm:$0xf]  ;;  %v2564_v3 = vor.u32 %v3409_v49, %v2561_v50  ;;  %v3400_v41 = vld [vmem:[#allocation6 + $0x1b4] sm:$0xf0] }
  0x6a   :  { %1455 = vmatpush.bf16.msrb.mxu2 %v3012_v18  ;;  %v2817_v57 = vld [vmem:[#allocation6 + $0x410] sm:$0xf0]  ;;  %v3537_v60 = vld [vmem:[#allocation6 + $0x604] sm:$0xf]  ;;  %v2692_v4 = vor.u32 %v3441_v51, %v2689_v53  ;;  %v3372_v18 = vld [vmem:[#allocation6 + $0xd4] sm:$0xf0] }
  0x6b   :  { %1430 = vmatpush.bf16.msra.mxu1 %v2740_v20  ;;  %1443 = vmatpush.bf16.msra.mxu3 %v2868_v24  ;;  %v3073_v0 = vld [vmem:[#allocation6 + $0x610] sm:$0xf0]  ;;  %v3505_v5 = vld [vmem:[#allocation6 + $0x504] sm:$0xf]  ;;  %v2820_v7 = vor.u32 %v3473_v55, %v2817_v57  ;;  %v2663_v20 = vld [vmem:[#allocation6 + $0x2c8] sm:$0xf]  ;;  %v2408_v25 = vor.u32 %v3372_v18, %v2407_v17 }
  0x6c   :  { %1418 = vmatpush.bf16.msra.mxu0 %v2596_v31  ;;  %v2945_v6 = vld [vmem:[#allocation6 + $0x510] sm:$0xf0]  ;;  %v3076_v12 = vor.u32 %v3537_v60, %v3073_v0  ;;  %v3468_v24 = vld [vmem:[#allocation6 + $0x3d4] sm:$0xf0]  ;;  %v2664_v28 = vor.u32 %v3436_v21, %v2663_v20  ;;  %v2375_v43 = vld [vmem:[#allocation6 + $0x88] sm:$0xf] }
  0x6d   :  { %v2948_v16 = vor.u32 %v3505_v5, %v2945_v6  ;;  %v2792_v31 = vor.u32 %v3468_v24, %v2791_v23  ;;  %v2631_v46 = vld [vmem:[#allocation6 + $0x288] sm:$0xf]  ;;  %v3460_v50 = vld [vmem:[#allocation6 + $0x394] sm:$0xf0] }
  0x6e   :  { %1456 = vmatpush.bf16.msrb.mxu2 %v2996_v30  ;;  %v3368_v30 = vld [vmem:[#allocation6 + $0xb4] sm:$0xf0]  ;;  %v2759_v49 = vld [vmem:[#allocation6 + $0x388] sm:$0xf] }
  0x6f   :  { %1431 = vmatpush.bf16.msra.mxu1 %v2724_v32  ;;  %1444 = vmatpush.bf16.msra.mxu3 %v2852_v37  ;;  %v2647_v32 = vld [vmem:[#allocation6 + $0x2a8] sm:$0xf]  ;;  %v3464_v37 = vld [vmem:[#allocation6 + $0x3b4] sm:$0xf0]  ;;  %v2392_v39 = vor.u32 %v3368_v30, %v2391_v29  ;;  %v2760_v59 = vor.u32 %v3460_v50, %v2759_v49  ;;  %v3374_v49 = vld [vmem:[#allocation6 + $0xec] sm:$0xf] }
  0x70   :  { %1419 = vmatpush.bf16.msra.mxu0 %v2580_v47  ;;  %v2648_v42 = vor.u32 %v3432_v34, %v2647_v32  ;;  %v2776_v45 = vor.u32 %v3464_v37, %v2775_v36  ;;  %v3428_v47 = vld [vmem:[#allocation6 + $0x294] sm:$0xf0]  ;;  %v2359_v57 = vld [vmem:[#allocation6 + $0x68] sm:$0xf]  ;;  %v2425_v50 = vld [vmem:[#allocation6 + $0xf8] sm:$0xf0] }
  0x71   :  { %v3396_v53 = vld [vmem:[#allocation6 + $0x194] sm:$0xf0]  ;;  %v2632_v55 = vor.u32 %v3428_v47, %v2631_v46  ;;  %v2615_v60 = vld [vmem:[#allocation6 + $0x268] sm:$0xf] }
  0x72   :  { %1457 = vmatpush.bf16.msrb.mxu2 %v2980_v44  ;;  %v3364_v44 = vld [vmem:[#allocation6 + $0x94] sm:$0xf0]  ;;  %v2743_v1 = vld [vmem:[#allocation6 + $0x368] sm:$0xf] }
  0x73   :  { %1432 = vmatpush.bf16.msra.mxu1 %v2708_v48  ;;  %1445 = vmatpush.bf16.msra.mxu3 %v2836_v52  ;;  %v2520_v48 = vor.u32 %v3400_v41, %v2519_v40  ;;  %v2376_v51 = vor.u32 %v3364_v44, %v2375_v43  ;;  %v2503_v52 = vld [vmem:[#allocation6 + $0x188] sm:$0xf]  ;;  %v3360_v58 = vld [vmem:[#allocation6 + $0x74] sm:$0xf0] }
  0x74   :  { %1420 = vmatpush.bf16.msra.mxu0 %v2564_v3  ;;  %v2504_v0 = vor.u32 %v3396_v53, %v2503_v52  ;;  %v3456_v2 = vld [vmem:[#allocation6 + $0x374] sm:$0xf0]  ;;  %v2360_v3 = vor.u32 %v3360_v58, %v2359_v57  ;;  %v2599_v11 = vld [vmem:[#allocation6 + $0x248] sm:$0xf] }
  0x75   :  { %v3392_v5 = vld [vmem:[#allocation6 + $0x174] sm:$0xf0]  ;;  %v2744_v10 = vor.u32 %v3456_v2, %v2743_v1  ;;  %v2727_v14 = vld [vmem:[#allocation6 + $0x348] sm:$0xf]  ;;  %v2428_v2 = vor.u32 %v3374_v49, %v2425_v50 }
  0x76   :  { %1458 = vmatpush.bf16.msrb.mxu2 %v2964_v61  ;;  %v3424_v61 = vld [vmem:[#allocation6 + $0x274] sm:$0xf0]  ;;  %v2471_v17 = vld [vmem:[#allocation6 + $0x148] sm:$0xf] }
  0x77   :  { %1433 = vmatpush.bf16.msra.mxu1 %v2692_v4  ;;  %1446 = vmatpush.bf16.msra.mxu3 %v2820_v7  ;;  %v2487_v4 = vld [vmem:[#allocation6 + $0x168] sm:$0xf]  ;;  %v2616_v6 = vor.u32 %v3424_v61, %v2615_v60  ;;  %v3388_v18 = vld [vmem:[#allocation6 + $0x154] sm:$0xf0]  ;;  %v3406_v61 = vld [vmem:[#allocation6 + $0x1ec] sm:$0xf] }
  0x78   :  { %1504 = vmatpush.bf16.msrb.mxu0 %v2680_v15  ;;  %v2343_v7 = vld [vmem:[#allocation6 + $0x48] sm:$0xf]  ;;  %v2488_v13 = vor.u32 %v3392_v5, %v2487_v4  ;;  %v3452_v15 = vld [vmem:[#allocation6 + $0x354] sm:$0xf0]  ;;  %v3370_v4 = vld [vmem:[#allocation6 + $0xcc] sm:$0xf] }
  0x79   :  { %1421 = vmatmul.bf16.vlgmr.msra.gmra.mxu0 %v3807_v54  ;;  %v2327_v20 = vld [vmem:[#allocation6 + $0x28] sm:$0xf]  ;;  %v3352_v21 = vld [vmem:[#allocation6 + $0x34] sm:$0xf0]  ;;  %v2409_v5 = vld [vmem:[#allocation6 + $0xd8] sm:$0xf0] }
  0x7a   :  { %1459 = vmatpush.bf16.msrb.mxu2 %v2948_v16  ;;  %1447 = vmatmul.bf16.vlgmr.msra.gmra.mxu3 %v3823_v33  ;;  %v2583_v23 = vld [vmem:[#allocation6 + $0x228] sm:$0xf]  ;;  %v3416_v24 = vld [vmem:[#allocation6 + $0x234] sm:$0xf0] }
  0x7b   :  { %1478 = vmatpush.bf16.msrb.mxu1 %v2424_v9  ;;  %1472 = vmatpush.bf16.msrb.mxu3 %v3076_v12  ;;  %v3356_v9 = vld [vmem:[#allocation6 + $0x54] sm:$0xf0]  ;;  %v2711_v26 = vld [vmem:[#allocation6 + $0x328] sm:$0xf]  ;;  %v2584_v32 = vor.u32 %v3416_v24, %v2583_v23 }
  0x7c   :  { %1434 = vmatmul.bf16.vlgmr.msra.gmra.mxu1 %v3809_v56  ;;  %1505 = vmatpush.bf16.msrb.mxu0 %v2664_v28  ;;  %v3420_v12 = vld [vmem:[#allocation6 + $0x254] sm:$0xf0]  ;;  %v2344_v16 = vor.u32 %v3356_v9, %v2343_v7  ;;  %v2328_v28 = vor.u32 %v3352_v21, %v2327_v20  ;;  %v2455_v29 = vld [vmem:[#allocation6 + $0x128] sm:$0xf] }
  0x7d   :  { %1460 = vmatmul.bf16.vlgmr.msrb.gmra.mxu2 %v3825_v38  ;;  %v3448_v27 = vld [vmem:[#allocation6 + $0x334] sm:$0xf0]  ;;  %v2567_v40 = vld [vmem:[#allocation6 + $0x208] sm:$0xf] }
  0x7e   :  { %1517 = vmatpush.bf16.msra.mxu2 %v2808_v19  ;;  %v2600_v19 = vor.u32 %v3420_v12, %v2599_v11  ;;  %v3384_v30 = vld [vmem:[#allocation6 + $0x134] sm:$0xf0]  ;;  %v2712_v37 = vor.u32 %v3448_v27, %v2711_v26  ;;  %v3063_v53 = vld [vmem:[#allocation6 + $0x5e8] sm:$0xf]  ;;  %v2521_v26 = vld [vmem:[#allocation6 + $0x1b8] sm:$0xf0] }
  0x7f   :  { %1491 = vmatpush.bf16.msra.mxu3 %v2552_v22  ;;  %1479 = vmatpush.bf16.msrb.mxu1 %v2408_v25  ;;  %v2728_v22 = vor.u32 %v3452_v15, %v2727_v14  ;;  %v2472_v25 = vor.u32 %v3388_v18, %v2471_v17  ;;  %v3348_v34 = vld [vmem:[#allocation6 + $0x14] sm:$0xf0]  ;;  %v2456_v43 = vor.u32 %v3384_v30, %v2455_v29  ;;  %v2919_v57 = vld [vmem:[#allocation6 + $0x4c8] sm:$0xf]  ;;  %v2537_v14 = vld [vmem:[#allocation6 + $0x1d8] sm:$0xf0] }
  0x80   :  { %1506 = vmatpush.bf16.msrb.mxu0 %v2648_v42  ;;  %v3504_v36 = vld [vmem:[#allocation6 + $0x4f4] sm:$0xf0]  ;;  %v2695_v42 = vld [vmem:[#allocation6 + $0x308] sm:$0xf]  ;;  %v2412_v15 = vor.u32 %v3370_v4, %v2409_v5  ;;  %v3366_v17 = vld [vmem:[#allocation6 + $0xac] sm:$0xf] }
  0x81   :  { %v3412_v41 = vld [vmem:[#allocation6 + $0x214] sm:$0xf0]  ;;  %v3047_v9 = vld [vmem:[#allocation6 + $0x5c8] sm:$0xf]  ;;  %v2393_v18 = vld [vmem:[#allocation6 + $0xb8] sm:$0xf0] }
  0x82   :  { %1518 = vmatpush.bf16.msra.mxu2 %v2792_v31  ;;  %v2311_v31 = vld [vmem:[#allocation6 + $0x8] sm:$0xf]  ;;  %v3444_v44 = vld [vmem:[#allocation6 + $0x314] sm:$0xf0]  ;;  %v2568_v52 = vor.u32 %v3412_v41, %v2567_v40  ;;  %v2396_v27 = vor.u32 %v3366_v17, %v2393_v18  ;;  %v3362_v29 = vld [vmem:[#allocation6 + $0x8c] sm:$0xf] }
  0x83   :  { %1492 = vmatpush.bf16.msra.mxu3 %v2536_v35  ;;  %1480 = vmatpush.bf16.msrb.mxu1 %v2392_v39  ;;  %v2935_v35 = vld [vmem:[#allocation6 + $0x4e8] sm:$0xf]  ;;  %v3540_v46 = vld [vmem:[#allocation6 + $0x614] sm:$0xf0]  ;;  %v2312_v47 = vor.u32 %v3348_v34, %v2311_v31  ;;  %v2696_v58 = vor.u32 %v3444_v44, %v2695_v42  ;;  %v2377_v30 = vld [vmem:[#allocation6 + $0x98] sm:$0xf0] }
  0x84   :  { %1507 = vmatpush.bf16.msrb.mxu0 %v2632_v55  ;;  %v2439_v39 = vld [vmem:[#allocation6 + $0x108] sm:$0xf]  ;;  %v3536_v55 = vld [vmem:[#allocation6 + $0x5f4] sm:$0xf0]  ;;  %v2505_v40 = vld [vmem:[#allocation6 + $0x198] sm:$0xf0]  ;;  %v2380_v41 = vor.u32 %v3362_v29, %v2377_v30 }
  0x85   :  { %v2903_v11 = vld [vmem:[#allocation6 + $0x4a8] sm:$0xf]  ;;  %v3496_v12 = vld [vmem:[#allocation6 + $0x4b4] sm:$0xf0]  ;;  %v2361_v44 = vld [vmem:[#allocation6 + $0x78] sm:$0xf0] }
  0x86   :  { %1519 = vmatpush.bf16.msra.mxu2 %v2776_v45  ;;  %v3079_v45 = vld [vmem:[#allocation6 + $0x608] sm:$0xf]  ;;  %v3492_v24 = vld [vmem:[#allocation6 + $0x494] sm:$0xf0]  ;;  %v2473_v4 = vld [vmem:[#allocation6 + $0x158] sm:$0xf0] }
  0x87   :  { %1493 = vmatpush.bf16.msra.mxu3 %v2520_v48  ;;  %1481 = vmatpush.bf16.msrb.mxu1 %v2376_v51  ;;  %v3380_v48 = vld [vmem:[#allocation6 + $0x114] sm:$0xf0]  ;;  %v2936_v51 = vor.u32 %v3504_v36, %v2935_v35  ;;  %v3080_v60 = vor.u32 %v3540_v46, %v3079_v45  ;;  %v3031_v21 = vld [vmem:[#allocation6 + $0x5a8] sm:$0xf]  ;;  %v2457_v17 = vld [vmem:[#allocation6 + $0x138] sm:$0xf0] }
  0x88   :  { %1508 = vmatpush.bf16.msrb.mxu0 %v2616_v6  ;;  %v2440_v1 = vor.u32 %v3380_v48, %v2439_v39  ;;  %v2887_v23 = vld [vmem:[#allocation6 + $0x488] sm:$0xf]  ;;  %v3524_v35 = vld [vmem:[#allocation6 + $0x594] sm:$0xf0]  ;;  %v3394_v39 = vld [vmem:[#allocation6 + $0x18c] sm:$0xf] }
  0x89   :  { %v2888_v31 = vor.u32 %v3492_v24, %v2887_v23  ;;  %v3015_v34 = vld [vmem:[#allocation6 + $0x588] sm:$0xf]  ;;  %v2508_v46 = vor.u32 %v3394_v39, %v2505_v40  ;;  %v3520_v48 = vld [vmem:[#allocation6 + $0x574] sm:$0xf0]  ;;  %v3346_v23 = vld [vmem:[#allocation6 + $0xc] sm:$0xf] }
  0x8a   :  { %1520 = vmatpush.bf16.msra.mxu2 %v2760_v59  ;;  %3086 = vmatmul.msk.bf16.vlgmr.msrb.gmra.mxu3 %vm1292_vm0, %v3819_v62  ;;  %v3500_v59 = vld [vmem:[#allocation6 + $0x4d4] sm:$0xf0]  ;;  %v2871_v36 = vld [vmem:[#allocation6 + $0x468] sm:$0xf]  ;;  %v3016_v42 = vor.u32 %v3524_v35, %v3015_v34  ;;  %v2313_v24 = vld [vmem:[#allocation6 + $0x18] sm:$0xf0] }
  0x8b   :  { %1494 = vmatpush.bf16.msra.mxu3 %v2504_v0  ;;  %1482 = vmatpush.bf16.msrb.mxu1 %v2360_v3  ;;  %v2553_v0 = vld [vmem:[#allocation6 + $0x1f8] sm:$0xf0]  ;;  %v3064_v3 = vor.u32 %v3536_v55, %v3063_v53  ;;  %v2920_v6 = vor.u32 %v3500_v59, %v2919_v57  ;;  %v2855_v49 = vld [vmem:[#allocation6 + $0x448] sm:$0xf]  ;;  %v3484_v50 = vld [vmem:[#allocation6 + $0x454] sm:$0xf0]  ;;  %v2316_v35 = vor.u32 %v3346_v23, %v2313_v24 }
  0x8c   :  { %1509 = vmatpush.bf16.msrb.mxu0 %v2600_v19  ;;  %v2556_v7 = vor.u32 %v3406_v61, %v2553_v0  ;;  %v2904_v19 = vor.u32 %v3496_v12, %v2903_v11  ;;  %v3354_v57 = vld [vmem:[#allocation6 + $0x4c] sm:$0xf]  ;;  %v2856_v59 = vor.u32 %v3484_v50, %v2855_v49  ;;  %v2983_v61 = vld [vmem:[#allocation6 + $0x548] sm:$0xf]  ;;  %v3516_v0 = vld [vmem:[#allocation6 + $0x554] sm:$0xf0] }
  0x8d   :  { %v2967_v12 = vld [vmem:[#allocation6 + $0x528] sm:$0xf]  ;;  %v2809_v29 = vld [vmem:[#allocation6 + $0x3f8] sm:$0xf0]  ;;  %v3434_v34 = vld [vmem:[#allocation6 + $0x2cc] sm:$0xf] }
  0x8e   :  { %1521 = vmatpush.bf16.msra.mxu2 %v2744_v10  ;;  %v3532_v10 = vld [vmem:[#allocation6 + $0x5d4] sm:$0xf0]  ;;  %v2441_v39 = vld [vmem:[#allocation6 + $0x118] sm:$0xf0]  ;;  %v3498_v49 = vld [vmem:[#allocation6 + $0x4cc] sm:$0xf] }
  0x8f   :  { %1495 = vmatpush.bf16.msra.mxu3 %v2488_v13  ;;  %1483 = vmatpush.bf16.msrb.mxu1 %v2344_v16  ;;  %v3402_v13 = vld [vmem:[#allocation6 + $0x1cc] sm:$0xf]  ;;  %v3048_v16 = vor.u32 %v3532_v10, %v3047_v9  ;;  %v2329_v9 = vld [vmem:[#allocation6 + $0x38] sm:$0xf0] }
  0x90   :  { %1510 = vmatpush.bf16.msrb.mxu0 %v2584_v32  ;;  %v2540_v20 = vor.u32 %v3402_v13, %v2537_v14  ;;  %v3512_v13 = vld [vmem:[#allocation6 + $0x534] sm:$0xf0]  ;;  %v2823_v14 = vld [vmem:[#allocation6 + $0x408] sm:$0xf]  ;;  %v2921_v50 = vld [vmem:[#allocation6 + $0x4d8] sm:$0xf0] }
  0x91   :  { %v3454_v23 = vld [vmem:[#allocation6 + $0x36c] sm:$0xf] }
  0x92   :  { %1522 = vmatpush.bf16.msra.mxu2 %v2728_v22  ;;  %v3528_v22 = vld [vmem:[#allocation6 + $0x5b4] sm:$0xf0] }
  0x93   :  { %1496 = vmatpush.bf16.msra.mxu3 %v2472_v25  ;;  %1484 = vmatpush.bf16.msrb.mxu1 %v2328_v28  ;;  %v3398_v25 = vld [vmem:[#allocation6 + $0x1ac] sm:$0xf]  ;;  %v3032_v28 = vor.u32 %v3528_v22, %v3031_v21  ;;  %v2968_v21 = vor.u32 %v3512_v13, %v2967_v12  ;;  %v2951_v22 = vld [vmem:[#allocation6 + $0x508] sm:$0xf]  ;;  %v2761_v13 = vld [vmem:[#allocation6 + $0x398] sm:$0xf0] }
  0x94   :  { %1511 = vmatpush.bf16.msrb.mxu0 %v2568_v52  ;;  %v2524_v32 = vor.u32 %v3398_v25, %v2521_v26  ;;  %v2489_v52 = vld [vmem:[#allocation6 + $0x178] sm:$0xf0] }
  0x96   :  { %1523 = vmatpush.bf16.msra.mxu2 %v2712_v37  ;;  %v3488_v37 = vld [vmem:[#allocation6 + $0x474] sm:$0xf0] }
  0x97   :  { %1497 = vmatpush.bf16.msra.mxu3 %v2456_v43  ;;  %1485 = vmatpush.bf16.msrb.mxu1 %v2312_v47  ;;  %v3358_v43 = vld [vmem:[#allocation6 + $0x6c] sm:$0xf]  ;;  %v2872_v45 = vor.u32 %v3488_v37, %v2871_v36  ;;  %v2999_v47 = vld [vmem:[#allocation6 + $0x568] sm:$0xf]  ;;  %v2665_v36 = vld [vmem:[#allocation6 + $0x2d8] sm:$0xf0] }
  0x98   :  { %1563 = vmatpush.bf16.msra.mxu0 %v3080_v60  ;;  %v2364_v53 = vor.u32 %v3358_v43, %v2361_v44  ;;  %v3000_v55 = vor.u32 %v3520_v48, %v2999_v47  ;;  %v3378_v37 = vld [vmem:[#allocation6 + $0x10c] sm:$0xf]  ;;  %v2793_v48 = vld [vmem:[#allocation6 + $0x3d8] sm:$0xf0] }
  0x99   :  { %1512 = vmatmul.bf16.vlgmr.msrb.gmra.mxu0 %v3807_v54  ;;  %v2444_v47 = vor.u32 %v3378_v37, %v2441_v39  ;;  %v3450_v39 = vld [vmem:[#allocation6 + $0x34c] sm:$0xf] }
  0x9a   :  { %1524 = vmatpush.bf16.msra.mxu2 %v2696_v58  ;;  %1486 = vmatmul.bf16.vlgmr.msrb.gmra.mxu1 %v3811_v63  ;;  %v2345_v58 = vld [vmem:[#allocation6 + $0x58] sm:$0xf0] }
  0x9b   :  { %1530 = vmatpush.bf16.msra.mxu1 %v2936_v51  ;;  %1498 = vmatpush.bf16.msra.mxu3 %v2440_v1  ;;  %v3390_v51 = vld [vmem:[#allocation6 + $0x16c] sm:$0xf]  ;;  %v2839_v1 = vld [vmem:[#allocation6 + $0x428] sm:$0xf]  ;;  %v2348_v5 = vor.u32 %v3354_v57, %v2345_v58  ;;  %v3049_v57 = vld [vmem:[#allocation6 + $0x5d8] sm:$0xf0] }
  0x9c   :  { %1582 = vmatpush.bf16.msrb.mxu0 %v2556_v7  ;;  %v2492_v60 = vor.u32 %v3390_v51, %v2489_v52  ;;  %v3350_v7 = vld [vmem:[#allocation6 + $0x2c] sm:$0xf] }
  0x9d   :  { %1525 = vmatmul.bf16.vlgmr.msra.gmra.mxu2 %v3809_v56  ;;  %v2332_v18 = vor.u32 %v3350_v7, %v2329_v9  ;;  %v3430_v52 = vld [vmem:[#allocation6 + $0x2ac] sm:$0xf]  ;;  %v3033_v7 = vld [vmem:[#allocation6 + $0x5b8] sm:$0xf0] }
  0x9e   :  { %1569 = vmatpush.bf16.msrb.mxu2 %v2428_v2  ;;  %1499 = vmatmul.bf16.vlgmr.msra.gmra.mxu3 %v3815_v8  ;;  %v3480_v2 = vld [vmem:[#allocation6 + $0x434] sm:$0xf0] }
  0x9f   :  { %1543 = vmatpush.bf16.msrb.mxu3 %v3064_v3  ;;  %1531 = vmatpush.bf16.msra.mxu1 %v2920_v6  ;;  %v3386_v3 = vld [vmem:[#allocation6 + $0x14c] sm:$0xf]  ;;  %v2984_v6 = vor.u32 %v3516_v0, %v2983_v61  ;;  %v2840_v10 = vor.u32 %v3480_v2, %v2839_v1  ;;  %v2777_v0 = vld [vmem:[#allocation6 + $0x3b8] sm:$0xf0] }
  0xa0   :  { %1583 = vmatpush.bf16.msrb.mxu0 %v2540_v20  ;;  %v2476_v11 = vor.u32 %v3386_v3, %v2473_v4  ;;  %v2681_v20 = vld [vmem:[#allocation6 + $0x2f8] sm:$0xf0]  ;;  %v3494_v1 = vld [vmem:[#allocation6 + $0x4ac] sm:$0xf] }
  0xa1   :  { %v2905_v2 = vld [vmem:[#allocation6 + $0x4b8] sm:$0xf0]  ;;  %v3426_v4 = vld [vmem:[#allocation6 + $0x28c] sm:$0xf] }
  0xa2   :  { %1570 = vmatpush.bf16.msrb.mxu2 %v2412_v15  ;;  %v3476_v15 = vld [vmem:[#allocation6 + $0x414] sm:$0xf0] }
  0xa3   :  { %1544 = vmatpush.bf16.msrb.mxu3 %v3048_v16  ;;  %1532 = vmatpush.bf16.msra.mxu1 %v2904_v19  ;;  %v3382_v16 = vld [vmem:[#allocation6 + $0x12c] sm:$0xf]  ;;  %v2824_v25 = vor.u32 %v3476_v15, %v2823_v14  ;;  %v2889_v15 = vld [vmem:[#allocation6 + $0x498] sm:$0xf0] }
  0xa4   :  { %1584 = vmatpush.bf16.msrb.mxu0 %v2524_v32  ;;  %v3438_v19 = vld [vmem:[#allocation6 + $0x2ec] sm:$0xf]  ;;  %v2460_v26 = vor.u32 %v3382_v16, %v2457_v17  ;;  %v2937_v32 = vld [vmem:[#allocation6 + $0x4f8] sm:$0xf0] }
  0xa5   :  { %v2684_v30 = vor.u32 %v3438_v19, %v2681_v20  ;;  %v3490_v14 = vld [vmem:[#allocation6 + $0x48c] sm:$0xf]  ;;  %v3017_v20 = vld [vmem:[#allocation6 + $0x598] sm:$0xf0] }
  0xa6   :  { %1571 = vmatpush.bf16.msrb.mxu2 %v2396_v27  ;;  %v3508_v27 = vld [vmem:[#allocation6 + $0x514] sm:$0xf0]  ;;  %v3422_v17 = vld [vmem:[#allocation6 + $0x26c] sm:$0xf] }
  0xa7   :  { %1545 = vmatpush.bf16.msrb.mxu3 %v3032_v28  ;;  %1533 = vmatpush.bf16.msra.mxu1 %v2888_v31  ;;  %v3470_v28 = vld [vmem:[#allocation6 + $0x3ec] sm:$0xf]  ;;  %v2952_v40 = vor.u32 %v3508_v27, %v2951_v22  ;;  %v2892_v22 = vor.u32 %v3490_v14, %v2889_v15  ;;  %v2873_v27 = vld [vmem:[#allocation6 + $0x478] sm:$0xf0] }
  0xa8   :  { %1585 = vmatpush.bf16.msrb.mxu0 %v2508_v46  ;;  %v3502_v31 = vld [vmem:[#allocation6 + $0x4ec] sm:$0xf]  ;;  %v2812_v43 = vor.u32 %v3470_v28, %v2809_v29  ;;  %v2668_v46 = vor.u32 %v3434_v34, %v2665_v36  ;;  %v3001_v34 = vld [vmem:[#allocation6 + $0x578] sm:$0xf0] }
  0xa9   :  { %3087 = vmatmul.msk.bf16.vlgmr.msra.gmra.mxu0 %vm1292_vm0, %v3819_v62  ;;  %v2940_v44 = vor.u32 %v3502_v31, %v2937_v32  ;;  %v3418_v29 = vld [vmem:[#allocation6 + $0x24c] sm:$0xf]  ;;  %v2697_v14 = vld [vmem:[#allocation6 + $0x318] sm:$0xf0] }
  0xaa   :  { %1572 = vmatpush.bf16.msrb.mxu2 %v2380_v41  ;;  %v3534_v41 = vld [vmem:[#allocation6 + $0x5ec] sm:$0xf] }
  0xab   :  { %1546 = vmatpush.bf16.msrb.mxu3 %v3016_v42  ;;  %1534 = vmatpush.bf16.msra.mxu1 %v2872_v45  ;;  %v3065_v42 = vld [vmem:[#allocation6 + $0x5f8] sm:$0xf0]  ;;  %v3466_v45 = vld [vmem:[#allocation6 + $0x3cc] sm:$0xf] }
  0xac   :  { %1586 = vmatpush.bf16.msrb.mxu0 %v2492_v60  ;;  %v3068_v51 = vor.u32 %v3534_v41, %v3065_v42  ;;  %v2796_v58 = vor.u32 %v3466_v45, %v2793_v48  ;;  %v3462_v60 = vld [vmem:[#allocation6 + $0x3ac] sm:$0xf]  ;;  %v2857_v45 = vld [vmem:[#allocation6 + $0x458] sm:$0xf0] }
  0xad   :  { %v2780_v9 = vor.u32 %v3462_v60, %v2777_v0  ;;  %v3518_v32 = vld [vmem:[#allocation6 + $0x56c] sm:$0xf]  ;;  %v2585_v48 = vld [vmem:[#allocation6 + $0x238] sm:$0xf0] }
  0xae   :  { %1573 = vmatpush.bf16.msrb.mxu2 %v2364_v53  ;;  %v2649_v53 = vld [vmem:[#allocation6 + $0x2b8] sm:$0xf0]  ;;  %v3478_v60 = vld [vmem:[#allocation6 + $0x42c] sm:$0xf] }
  0xaf   :  { %1547 = vmatpush.bf16.msrb.mxu3 %v3000_v55  ;;  %1535 = vmatpush.bf16.msra.mxu1 %v2856_v59  ;;  %v3530_v55 = vld [vmem:[#allocation6 + $0x5cc] sm:$0xf]  ;;  %v2924_v59 = vor.u32 %v3498_v49, %v2921_v50  ;;  %v2652_v61 = vor.u32 %v3430_v52, %v2649_v53  ;;  %v2985_v52 = vld [vmem:[#allocation6 + $0x558] sm:$0xf0] }
  0xb0   :  { %1587 = vmatpush.bf16.msrb.mxu0 %v2476_v11  ;;  %v3052_v3 = vor.u32 %v3530_v55, %v3049_v57  ;;  %v3458_v11 = vld [vmem:[#allocation6 + $0x38c] sm:$0xf] }
  0xb1   :  { %v3446_v57 = vld [vmem:[#allocation6 + $0x32c] sm:$0xf] }
  0xb2   :  { %1574 = vmatpush.bf16.msrb.mxu2 %v2348_v5  ;;  %v2633_v5 = vld [vmem:[#allocation6 + $0x298] sm:$0xf0]  ;;  %v3474_v15 = vld [vmem:[#allocation6 + $0x40c] sm:$0xf] }
  0xb3   :  { %1548 = vmatpush.bf16.msrb.mxu3 %v2984_v6  ;;  %1536 = vmatpush.bf16.msra.mxu1 %v2840_v10  ;;  %v3526_v6 = vld [vmem:[#allocation6 + $0x5ac] sm:$0xf]  ;;  %v2908_v10 = vor.u32 %v3494_v1, %v2905_v2  ;;  %v2636_v12 = vor.u32 %v3426_v4, %v2633_v5  ;;  %v2569_v2 = vld [vmem:[#allocation6 + $0x218] sm:$0xf0] }
  0xb4   :  { %1588 = vmatpush.bf16.msrb.mxu0 %v2460_v26  ;;  %v3036_v16 = vor.u32 %v3526_v6, %v3033_v7  ;;  %v3486_v26 = vld [vmem:[#allocation6 + $0x46c] sm:$0xf]  ;;  %v2969_v5 = vld [vmem:[#allocation6 + $0x538] sm:$0xf0] }
  0xb5   :  { %v2876_v37 = vor.u32 %v3486_v26, %v2873_v27  ;;  %v3410_v1 = vld [vmem:[#allocation6 + $0x20c] sm:$0xf]  ;;  %v3081_v7 = vld [vmem:[#allocation6 + $0x618] sm:$0xf0] }
  0xb6   :  { %1575 = vmatpush.bf16.msrb.mxu2 %v2332_v18  ;;  %v2617_v18 = vld [vmem:[#allocation6 + $0x278] sm:$0xf0]  ;;  %v3538_v6 = vld [vmem:[#allocation6 + $0x60c] sm:$0xf] }
  0xb7   :  { %1549 = vmatpush.bf16.msrb.mxu3 %v2968_v21  ;;  %1537 = vmatpush.bf16.msra.mxu1 %v2824_v25  ;;  %v2764_v21 = vor.u32 %v3458_v11, %v2761_v13  ;;  %v2620_v24 = vor.u32 %v3422_v17, %v2617_v18  ;;  %v2745_v25 = vld [vmem:[#allocation6 + $0x378] sm:$0xf0]  ;;  %v2572_v13 = vor.u32 %v3410_v1, %v2569_v2  ;;  %v3171_v1 = vld [vmem:[#allocation9 + $0xa0] sm:$0xf] }
  0xb8   :  { %1589 = vmatpush.bf16.msrb.mxu0 %v2444_v47  ;;  %v2748_v36 = vor.u32 %v3454_v23, %v2745_v25  ;;  %v3414_v47 = vld [vmem:[#allocation6 + $0x22c] sm:$0xf]  ;;  %v3211_v23 = vld [vmem:[#allocation9 + $0xf0] sm:$0xf] }
  0xba   :  { %1576 = vmatpush.bf16.msrb.mxu2 %v2316_v35  ;;  %1538 = vmatmul.bf16.vlgmr.msra.gmra.mxu1 %v3823_v33 }
  0xbb   :  { %1595 = vmatpush.bf16.msrb.mxu1 %v2684_v30  ;;  %1550 = vmatpush.bf16.msrb.mxu3 %v2952_v40  ;;  %v1305_v19 = vpop.f32.mrf.mxu0  ;;  %v2601_v30 = vld [vmem:[#allocation6 + $0x258] sm:$0xf0] }
  0xbc   :  { %1634 = vmatpush.bf16.msra.mxu0 %v3068_v51  ;;  %v2604_v40 = vor.u32 %v3418_v29, %v2601_v30  ;;  %v3514_v51 = vld [vmem:[#allocation6 + $0x54c] sm:$0xf]  ;;  %v3139_v30 = vld [vmem:[#allocation9 + $0x60] sm:$0xf] }
  0xbd   :  { %1577 = vmatmul.bf16.vlgmr.msrb.gmra.mxu2 %v3811_v63  ;;  %1590 = vmatmul.bf16.vlgmr.msrb.gmra.mxu0 %v3815_v8  ;;  %v3522_v63 = vld [vmem:[#allocation6 + $0x58c] sm:$0xf]  ;;  %v1318_v8 = vpop.f32.mrf.mxu1  ;;  %v2988_v0 = vor.u32 %v3514_v51, %v2985_v52  ;;  %v3115_v52 = vld [vmem:[#allocation9 + $0x30] sm:$0xf] }
  0xbe   :  { %1621 = vmatpush.bf16.msra.mxu2 %v2940_v44  ;;  %1551 = vmatmul.bf16.vlgmr.msrb.gmra.mxu3 %v3825_v38  ;;  %v3020_v28 = vor.u32 %v3522_v63, %v3017_v20  ;;  %v1319_v31 = vadd.f32 %v1318_v8, %v1305_v19  ;;  %v3482_v44 = vld [vmem:[#allocation6 + $0x44c] sm:$0xf]  ;;  %v3084_v19 = vor.u32 %v3538_v6, %v3081_v7  ;;  %v3147_v20 = vld [vmem:[#allocation9 + $0x70] sm:$0xf]  ;;  %v3544_v6 = vld [vmem:[#allocation9 + $0x14] sm:$0xf0] }
  0xbf   :  { %1608 = vmatpush.bf16.msra.mxu3 %v2812_v43  ;;  %1596 = vmatpush.bf16.msrb.mxu1 %v2668_v46  ;;  %v2729_v43 = vld [vmem:[#allocation6 + $0x358] sm:$0xf0]  ;;  %v3004_v46 = vor.u32 %v3518_v32, %v3001_v34  ;;  %v2860_v55 = vor.u32 %v3482_v44, %v2857_v45  ;;  %v3506_v63 = vld [vmem:[#allocation6 + $0x50c] sm:$0xf]  ;;  %v3203_v32 = vld [vmem:[#allocation9 + $0xe0] sm:$0xf] }
  0xc0   :  { %1635 = vmatpush.bf16.msra.mxu0 %v3052_v3  ;;  %v1331_v35 = vpop.f32.mrf.mxu2  ;;  %v1344_v42 = vpop.f32.mrf.mxu3  ;;  %v2732_v53 = vor.u32 %v3450_v39, %v2729_v43  ;;  %v3510_v3 = vld [vmem:[#allocation6 + $0x52c] sm:$0xf]  ;;  %v3131_v39 = vld [vmem:[#allocation9 + $0x50] sm:$0xf]  ;;  %v3187_v45 = vld [vmem:[#allocation9 + $0xc0] sm:$0xf] }
  0xc1   :  { %v1332_v41 = vadd.f32 %v1331_v35, %v1319_v31  ;;  %v2972_v18 = vor.u32 %v3510_v3, %v2969_v5  ;;  %v3554_v31 = vld [vmem:[#allocation9 + $0x64] sm:$0xf0]  ;;  %v3099_v5 = vld [vmem:[#allocation9 + $0x10] sm:$0xf] }
  0xc2   :  { %1622 = vmatpush.bf16.msra.mxu2 %v2924_v59  ;;  %v2713_v59 = vld [vmem:[#allocation6 + $0x338] sm:$0xf0]  ;;  %v3140_v34 = vor.u32 %v3554_v31, %v3139_v30  ;;  %v3570_v35 = vld [vmem:[#allocation9 + $0xe4] sm:$0xf0] }
  0xc3   :  { %1609 = vmatpush.bf16.msra.mxu3 %v2796_v58  ;;  %1597 = vmatpush.bf16.msrb.mxu1 %v2652_v61  ;;  %v1307_v49 = vpop.f32.mrf.mxu0  ;;  %v3847_v50 = vadd.f32 %v1344_v42, %v1332_v41  ;;  %v2588_v58 = vor.u32 %v3414_v47, %v2585_v48  ;;  %v2841_v61 = vld [vmem:[#allocation6 + $0x438] sm:$0xf0]  ;;  %v3550_v44 = vld [vmem:[#allocation9 + $0x44] sm:$0xf0] }
  0xc4   :  { %1636 = vmatpush.bf16.msra.mxu0 %v3036_v16  ;;  %v2844_v11 = vor.u32 %v3478_v60, %v2841_v61  ;;  %v2825_v16 = vld [vmem:[#allocation6 + $0x418] sm:$0xf0]  ;;  %v3566_v47 = vld [vmem:[#allocation9 + $0xc4] sm:$0xf0]  ;;  %v3107_v61 = vld [vmem:[#allocation9 + $0x20] sm:$0xf] }
  0xc5   :  { %v1320_v4 = vpop.f32.mrf.mxu1  ;;  %v2828_v26 = vor.u32 %v3474_v15, %v2825_v16  ;;  %v3568_v41 = vld [vmem:[#allocation9 + $0xd4] sm:$0xf0]  ;;  %v3188_v51 = vor.u32 %v3566_v47, %v3187_v45  ;;  %v3542_v15 = vld [vmem:[#allocation9 + $0x4] sm:$0xf0]  ;;  %v3155_v16 = vld [vmem:[#allocation9 + $0x80] sm:$0xf] }
  0xc6   :  { %1623 = vmatpush.bf16.msra.mxu2 %v2908_v10  ;;  %v2716_v10 = vor.u32 %v3446_v57, %v2713_v59  ;;  %v3564_v59 = vld [vmem:[#allocation9 + $0xb4] sm:$0xf0]  ;;  %v3562_v4 = vld [vmem:[#allocation9 + $0xa4] sm:$0xf0] }
  0xc7   :  { %1610 = vmatpush.bf16.msra.mxu3 %v2780_v9  ;;  %1598 = vmatpush.bf16.msrb.mxu1 %v2636_v12  ;;  %v3442_v12 = vld [vmem:[#allocation6 + $0x30c] sm:$0xf]  ;;  %v3172_v7 = vor.u32 %v3562_v4, %v3171_v1  ;;  %v3561_v1 = vld [vmem:[#allocation9 + $0xa4] sm:$0xf]  ;;  %v3173_v4 = vld [vmem:[#allocation9 + $0xa8] sm:$0xf0] }
  0xc8   :  { %1637 = vmatpush.bf16.msra.mxu0 %v3020_v28  ;;  %v1333_v9 = vpop.f32.mrf.mxu2  ;;  %v1346_v17 = vpop.f32.mrf.mxu3  ;;  %v2700_v25 = vor.u32 %v3442_v12, %v2697_v14  ;;  %v3091_v14 = vld [vmem:[#allocation9] sm:$0xf] }
  0xc9   :  { %v3163_v9 = vld [vmem:[#allocation9 + $0x90] sm:$0xf]  ;;  %v3558_v17 = vld [vmem:[#allocation9 + $0x84] sm:$0xf0] }
  0xca   :  { %1624 = vmatpush.bf16.msra.mxu2 %v2892_v22  ;;  %v2953_v22 = vld [vmem:[#allocation6 + $0x518] sm:$0xf0] }
  0xcb   :  { %1611 = vmatpush.bf16.msra.mxu3 %v2764_v21  ;;  %1599 = vmatpush.bf16.msrb.mxu1 %v2620_v24  ;;  %v3556_v21 = vld [vmem:[#allocation9 + $0x74] sm:$0xf0]  ;;  %v2956_v28 = vor.u32 %v3506_v63, %v2953_v22  ;;  %v3555_v63 = vld [vmem:[#allocation9 + $0x74] sm:$0xf] }
  0xcc   :  { %1638 = vmatpush.bf16.msra.mxu0 %v3004_v46  ;;  %v3572_v24 = vld [vmem:[#allocation9 + $0xf4] sm:$0xf0]  ;;  %v3148_v27 = vor.u32 %v3556_v21, %v3147_v20  ;;  %v3149_v20 = vld [vmem:[#allocation9 + $0x78] sm:$0xf0]  ;;  %v3571_v21 = vld [vmem:[#allocation9 + $0xf4] sm:$0xf] }
  0xcd   :  { %v3212_v8 = vor.u32 %v3572_v24, %v3211_v23  ;;  %v3152_v22 = vor.u32 %v3555_v63, %v3149_v20  ;;  %v3213_v23 = vld [vmem:[#allocation9 + $0xf8] sm:$0xf0]  ;;  %v3093_v63 = vld [vmem:[#allocation9 + $0x8] sm:$0xf0]  ;;  %v3557_v20 = vld [vmem:[#allocation9 + $0x84] sm:$0xf] }
  0xce   :  { %1625 = vmatpush.bf16.msra.mxu2 %v2876_v37  ;;  %v3216_v24 = vor.u32 %v3571_v21, %v3213_v23  ;;  %v3157_v21 = vld [vmem:[#allocation9 + $0x88] sm:$0xf0] }
  0xcf   :  { %1612 = vmatpush.bf16.msra.mxu3 %v2748_v36  ;;  %1600 = vmatpush.bf16.msrb.mxu1 %v2604_v40  ;;  %v3552_v40 = vld [vmem:[#allocation9 + $0x54] sm:$0xf0] }
  0xd0   :  { %1639 = vmatpush.bf16.msra.mxu0 %v2988_v0  ;;  %v3852_v29 = vpop.f32.mrf.mxu2  ;;  %v3546_v0 = vld [vmem:[#allocation9 + $0x24] sm:$0xf0] }
  0xd1   :  { %v3108_v3 = vor.u32 %v3546_v0, %v3107_v61  ;;  %v3545_v61 = vld [vmem:[#allocation9 + $0x24] sm:$0xf]  ;;  %v3109_v0 = vld [vmem:[#allocation9 + $0x28] sm:$0xf0] }
  0xd2   :  { %1626 = vmatpush.bf16.msra.mxu2 %v2860_v55  ;;  %v3179_v55 = vld [vmem:[#allocation9 + $0xb0] sm:$0xf] }
  0xd3   :  { %1613 = vmatpush.bf16.msra.mxu3 %v2732_v53  ;;  %1601 = vmatpush.bf16.msrb.mxu1 %v2588_v58  ;;  %v3548_v53 = vld [vmem:[#allocation9 + $0x34] sm:$0xf0]  ;;  %v3180_v60 = vor.u32 %v3564_v59, %v3179_v55 }
  0xd4   :  { %1640 = vmatpush.bf16.msra.mxu0 %v2972_v18  ;;  %v3116_v58 = vor.u32 %v3548_v53, %v3115_v52  ;;  %v3092_v18 = vor.u32 %v3542_v15, %v3091_v14  ;;  %v3563_v52 = vld [vmem:[#allocation9 + $0xb4] sm:$0xf] }
  0xd6   :  { %1627 = vmatpush.bf16.msra.mxu2 %v2844_v11  ;;  %v3855_v36 = vpop.f32.mrf.mxu0  ;;  %v3100_v11 = vor.u32 %v3544_v6, %v3099_v5  ;;  %v1665_v5 = vld [vmem:[#allocation1] sm:$0xff]  ;;  %v3176_v6 = vor.u32 %v3561_v1, %v3173_v4  ;;  %v3259_v4 = vld [vmem:[#allocation9 + $0x150] sm:$0xf] }
  0xd7   :  { %1614 = vmatpush.bf16.msra.mxu3 %v2716_v10  ;;  %1602 = vmatpush.bf16.msrb.mxu1 %v2572_v13  ;;  %v3857_v37 = vpop.f32.mrf.mxu1 }
  0xd8   :  { %1641 = vmatpush.bf16.msra.mxu0 %v2956_v28  ;;  %v1385_v43 = vpop.f32.mrf.mxu2 }
  0xd9   :  { %v3189_v43 = vld [vmem:[#allocation9 + $0xc8] sm:$0xf0] }
  0xda   :  { %1603 = vmatmul.bf16.vlgmr.msrb.gmra.mxu1 %v3807_v54  ;;  %1628 = vmatpush.bf16.msra.mxu2 %v2828_v26  ;;  %v3204_v54 = vor.u32 %v3570_v35, %v3203_v32  ;;  %v3141_v26 = vld [vmem:[#allocation9 + $0x68] sm:$0xf0]  ;;  %v3551_v32 = vld [vmem:[#allocation9 + $0x54] sm:$0xf] }
  0xdb   :  { %1654 = vmatpush.bf16.msra.mxu1 %v3084_v19  ;;  %1615 = vmatpush.bf16.msra.mxu3 %v2700_v25  ;;  %v3156_v19 = vor.u32 %v3558_v17, %v3155_v16  ;;  %v3553_v25 = vld [vmem:[#allocation9 + $0x64] sm:$0xf]  ;;  %v3567_v35 = vld [vmem:[#allocation9 + $0xd4] sm:$0xf]  ;;  %v1669_v16 = vpack.i.b16 %v1665_v5, %v1665_v5  ;;  %v3584_v5 = vld [vmem:[#allocation9 + $0x154] sm:$0xf0] }
  0xdc   :  { %1642 = vmatmul.bf16.vlgmr.msra.gmra.mxu0 %v3825_v38  ;;  %v3123_v38 = vld [vmem:[#allocation9 + $0x40] sm:$0xf]  ;;  %v3144_v28 = vor.u32 %v3553_v25, %v3141_v26 }
  0xdd   :  { %1629 = vmatmul.bf16.vlgmr.msra.gmra.mxu2 %v3823_v33  ;;  %v3132_v33 = vor.u32 %v3552_v40, %v3131_v39  ;;  %v3124_v46 = vor.u32 %v3550_v44, %v3123_v38  ;;  %v3197_v39 = vld [vmem:[#allocation9 + $0xd8] sm:$0xf0]  ;;  %v1671_v25 = vperm.slane %v1669_v16, 0 }
  0xde   :  { %1616 = vmatmul.bf16.vlgmr.msra.gmra.mxu3 %v3809_v56  ;;  %v3195_v56 = vld [vmem:[#allocation9 + $0xd0] sm:$0xf]  ;;  %v1359_v49 = vpop.f32.mrf.mxu0 }
  0xdf   :  { %2101 = vmatpush.bf16.msrb.mxu3 %v3148_v27  ;;  %2114 = vmatpush.bf16.msrb.mxu1 %v3212_v8  ;;  %v3196_v42 = vor.u32 %v3568_v41, %v3195_v56  ;;  %v3859_v48 = vpop.f32.mrf.mxu3  ;;  %v1372_v57 = vpop.f32.mrf.mxu1  ;;  %v3569_v27 = vld [vmem:[#allocation9 + $0xe4] sm:$0xf]  ;;  %v3205_v8 = vld [vmem:[#allocation9 + $0xe8] sm:$0xf0]  ;;  %v3200_v56 = vor.u32 %v3567_v35, %v3197_v39  ;;  %v3547_v49 = vld [vmem:[#allocation9 + $0x34] sm:$0xf] }
  0xe0   :  { %v3863_v2 = vpop.f32.mrf.mxu2  ;;  %v3208_v30 = vor.u32 %v3569_v27, %v3205_v8  ;;  %v3125_v41 = vld [vmem:[#allocation9 + $0x48] sm:$0xf0] }
  0xe1   :  { %v1410_v53 = vadd.f32 %v3863_v2, %v3859_v48  ;;  %v3559_v48 = vld [vmem:[#allocation9 + $0x94] sm:$0xf]  ;;  %v3165_v2 = vld [vmem:[#allocation9 + $0x98] sm:$0xf0] }
  0xe3   :  { %2102 = vmatpush.bf16.msrb.mxu3 %v3140_v34  ;;  %2115 = vmatpush.bf16.msrb.mxu1 %v3204_v54  ;;  %v3133_v34 = vld [vmem:[#allocation9 + $0x58] sm:$0xf0] }
  0xe4   :  { %v3136_v54 = vor.u32 %v3551_v32, %v3133_v34 }
  0xe7   :  { %2103 = vmatpush.bf16.msrb.mxu3 %v3132_v33  ;;  %2116 = vmatpush.bf16.msrb.mxu1 %v3196_v42  ;;  %v1398_v10 = vpop.f32.mrf.mxu3  ;;  %v3549_v33 = vld [vmem:[#allocation9 + $0x44] sm:$0xf] }
  0xe8   :  { %v1411_v13 = vpop.f32.mrf.mxu2  ;;  %v3565_v42 = vld [vmem:[#allocation9 + $0xc4] sm:$0xf]  ;;  %v3128_v38 = vor.u32 %v3549_v33, %v3125_v41  ;;  %v1666_v10 = vld [vmem:[#allocation1 + $0x9] sm:$0xff] }
  0xe9   :  { %v3192_v44 = vor.u32 %v3565_v42, %v3189_v43  ;;  %v1672_v17 = vpack.i.b16 %v1666_v10, %v1666_v10 }
  0xea   :  { %3088 = vmatmul.msk.bf16.vlgmr.msra.gmra.mxu1 %vm1292_vm0, %v3819_v62  ;;  %v3560_v62 = vld [vmem:[#allocation9 + $0x94] sm:$0xf0] }
  0xeb   :  { %2104 = vmatpush.bf16.msrb.mxu3 %v3124_v46  ;;  %2117 = vmatpush.bf16.msrb.mxu1 %v3188_v51  ;;  %v3164_v12 = vor.u32 %v3560_v62, %v3163_v9  ;;  %v3117_v51 = vld [vmem:[#allocation9 + $0x38] sm:$0xf0] }
  0xec   :  { %v3120_v57 = vor.u32 %v3547_v49, %v3117_v51  ;;  %v3101_v9 = vld [vmem:[#allocation9 + $0x18] sm:$0xf0]  ;;  %v3339_v49 = vld [vmem:[#allocation9 + $0x1f0] sm:$0xf] }
  0xef   :  { %2105 = vmatpush.bf16.msrb.mxu3 %v3116_v58  ;;  %2118 = vmatpush.bf16.msrb.mxu1 %v3180_v60  ;;  %v3181_v58 = vld [vmem:[#allocation9 + $0xb8] sm:$0xf0] }
  0xf0   :  { %v3184_v59 = vor.u32 %v3563_v52, %v3181_v58 }
  0xf3   :  { %2106 = vmatpush.bf16.msrb.mxu3 %v3108_v3  ;;  %2119 = vmatpush.bf16.msrb.mxu1 %v3172_v7  ;;  %v3112_v3 = vor.u32 %v3545_v61, %v3109_v0  ;;  %v3543_v7 = vld [vmem:[#allocation9 + $0x14] sm:$0xf]  ;;  %v3586_v61 = vld [vmem:[#allocation9 + $0x164] sm:$0xf0]  ;;  %v3331_v0 = vld [vmem:[#allocation9 + $0x1e0] sm:$0xf] }
  0xf4   :  { %v3104_v14 = vor.u32 %v3543_v7, %v3101_v9  ;;  %v3323_v7 = vld [vmem:[#allocation9 + $0x1d0] sm:$0xf]  ;;  %v3600_v9 = vld [vmem:[#allocation9 + $0x1d4] sm:$0xf0] }
  0xf6   :  { %v1422_v31 = vpop.f32.mrf.mxu0 }
  0xf7   :  { %2107 = vmatpush.bf16.msrb.mxu3 %v3100_v11  ;;  %2120 = vmatpush.bf16.msrb.mxu1 %v3164_v12  ;;  %v1423_v60 = vadd.f32 %v1422_v31, %v1410_v53  ;;  %v1358_v11 = vadd.f32 %v3855_v36, %v3847_v50  ;;  %v1674_v50 = vperm.slane %v1672_v17, 0  ;;  %v3160_v36 = vor.u32 %v3557_v20, %v3157_v21  ;;  %v3598_v17 = vld [vmem:[#allocation9 + $0x1c4] sm:$0xf0]  ;;  %v3580_v20 = vld [vmem:[#allocation9 + $0x134] sm:$0xf0] }
  0xf8   :  { %v3307_v21 = vld [vmem:[#allocation9 + $0x1b0] sm:$0xf] }
  0xf9   :  { %v1435_v40 = vpop.f32.mrf.mxu1  ;;  %v1686_v31 = vunpack.c.l.bf16 %v1674_v50  ;;  %v3235_v50 = vld [vmem:[#allocation9 + $0x120] sm:$0xf] }
  0xfa   :  { %v1436_v12 = vadd.f32 %v1435_v40, %v1423_v60  ;;  %v3267_v60 = vld [vmem:[#allocation9 + $0x160] sm:$0xf] }
  0xfb   :  { %2108 = vmatpush.bf16.msrb.mxu3 %v3092_v18  ;;  %2121 = vmatpush.bf16.msrb.mxu1 %v3156_v19  ;;  %v3168_v18 = vor.u32 %v3559_v48, %v3165_v2  ;;  %v3541_v19 = vld [vmem:[#allocation9 + $0x4] sm:$0xf]  ;;  %v3268_v1 = vor.u32 %v3586_v61, %v3267_v60  ;;  %v3260_v48 = vor.u32 %v3584_v5, %v3259_v4  ;;  %v3269_v61 = vld [vmem:[#allocation9 + $0x168] sm:$0xf0]  ;;  %v3583_v5 = vld [vmem:[#allocation9 + $0x154] sm:$0xf] }
  0xfc   :  { %v3096_v23 = vor.u32 %v3541_v19, %v3093_v63  ;;  %v3243_v63 = vld [vmem:[#allocation9 + $0x130] sm:$0xf]  ;;  %v3585_v60 = vld [vmem:[#allocation9 + $0x164] sm:$0xf] }
  0xfd   :  { %v1448_v45 = vpop.f32.mrf.mxu3 }
  0xfe   :  { %v1424_v46 = vpop.f32.mrf.mxu0  ;;  %v1449_v15 = vadd.f32 %v1448_v45, %v1436_v12 }
  0xff   :  { %2153 = vmatpush.bf16.msra.mxu3 %v3152_v22  ;;  %2166 = vmatpush.bf16.msra.mxu1 %v3216_v24  ;;  %v1371_v22 = vadd.f32 %v3857_v37, %v1358_v11  ;;  %v3275_v46 = vld [vmem:[#allocation9 + $0x170] sm:$0xf]  ;;  %v3324_v11 = vor.u32 %v3600_v9, %v3323_v7  ;;  %v3599_v7 = vld [vmem:[#allocation9 + $0x1d4] sm:$0xf] }
 0x100   :  { %v1461_v47 = vpop.f32.mrf.mxu2 }
 0x101   :  { %v1437_v55 = vpop.f32.mrf.mxu1  ;;  %v1462_v24 = vadd.f32 %v1461_v47, %v1449_v15  ;;  %v1384_v27 = vadd.f32 %v3852_v29, %v1371_v22  ;;  %v3588_v47 = vld [vmem:[#allocation9 + $0x174] sm:$0xf0]  ;;  %v3315_v15 = vld [vmem:[#allocation9 + $0x1c0] sm:$0xf]  ;;  %v3244_v22 = vor.u32 %v3580_v20, %v3243_v63  ;;  %v3245_v63 = vld [vmem:[#allocation9 + $0x138] sm:$0xf0] }
 0x102   :  { %v3276_v55 = vor.u32 %v3588_v47, %v3275_v46  ;;  %v3316_v19 = vor.u32 %v3598_v17, %v3315_v15  ;;  %v3587_v47 = vld [vmem:[#allocation9 + $0x174] sm:$0xf] }
 0x103   :  { %2154 = vmatpush.bf16.msra.mxu3 %v3144_v28  ;;  %2167 = vmatpush.bf16.msra.mxu1 %v3208_v30  ;;  %v1685_v30 = vunpack.c.l.bf16 %v1671_v25  ;;  %v3595_v20 = vld [vmem:[#allocation9 + $0x1b4] sm:$0xf] }
 0x104   :  { %2127 = vmatpush.bf16.msrb.mxu2 %v3276_v55 }
 0x105   :  { %v1450_v62 = vpop.f32.mrf.mxu3 }
 0x107   :  { %2155 = vmatpush.bf16.msra.mxu3 %v3136_v54  ;;  %2168 = vmatpush.bf16.msra.mxu1 %v3200_v56 }
 0x108   :  { %v1463_v13 = vpop.f32.mrf.mxu2  ;;  %2128 = vmatpush.bf16.msrb.mxu2 %v3268_v1  ;;  %v3272_v1 = vor.u32 %v3585_v60, %v3269_v61 }
 0x109   :  { %v3251_v13 = vld [vmem:[#allocation9 + $0x140] sm:$0xf] }
 0x10b   :  { %2156 = vmatpush.bf16.msra.mxu3 %v3128_v38  ;;  %2169 = vmatpush.bf16.msra.mxu1 %v3192_v44 }
 0x10c   :  { %2129 = vmatpush.bf16.msrb.mxu2 %v3260_v48 }
 0x10d   :  { %v1474_v26 = vpop.f32.mrf.mxu3 }
 0x10e   :  { %v1475_v28 = vadd.f32 %v1474_v26, %v1462_v24  ;;  %v3299_v26 = vld [vmem:[#allocation9 + $0x1a0] sm:$0xf] }
 0x10f   :  { %2157 = vmatpush.bf16.msra.mxu3 %v3120_v57  ;;  %2170 = vmatpush.bf16.msra.mxu1 %v3184_v59  ;;  %v3604_v57 = vld [vmem:[#allocation9 + $0x1f4] sm:$0xf0] }
 0x110   :  { %v1660_v8 = vpack.c.bf16 %v1475_v28, %v1384_v27  ;;  %v3340_v58 = vor.u32 %v3604_v57, %v3339_v49  ;;  %v3594_v28 = vld [vmem:[#allocation9 + $0x1a4] sm:$0xf0]  ;;  %v3277_v49 = vld [vmem:[#allocation9 + $0x178] sm:$0xf0] }
 0x111   :  { %v3280_v55 = vor.u32 %v3587_v47, %v3277_v49  ;;  %v3341_v57 = vld [vmem:[#allocation9 + $0x1f8] sm:$0xf0]  ;;  %v3573_v47 = vld [vmem:[#allocation9 + $0x104] sm:$0xf]  ;;  %v3221_v49 = vld [vmem:[#allocation9 + $0x108] sm:$0xf0] }
 0x112   :  { %v1681_v32 = vunpack.c.l.bf16 %v1660_v8  ;;  %v1682_v34 = vunpack.c.h.bf16 %v1660_v8  ;;  %2140 = vmatpush.bf16.msrb.mxu0 %v3340_v58 }
 0x113   :  { %2158 = vmatpush.bf16.msra.mxu3 %v3112_v3  ;;  %2171 = vmatpush.bf16.msra.mxu1 %v3176_v6  ;;  %v3602_v3 = vld [vmem:[#allocation9 + $0x1e4] sm:$0xf0] }
 0x114   :  { %v1689_v35 = vadd.f32 %v1685_v30, %v1681_v32  ;;  %v1690_v37 = vadd.f32 %v1686_v31, %v1682_v34  ;;  %v3332_v6 = vor.u32 %v3602_v3, %v3331_v0  ;;  %v3300_v30 = vor.u32 %v3594_v28, %v3299_v26  ;;  %v3227_v34 = vld [vmem:[#allocation9 + $0x110] sm:$0xf]  ;;  %v3601_v0 = vld [vmem:[#allocation9 + $0x1e4] sm:$0xf]  ;;  %v3333_v3 = vld [vmem:[#allocation9 + $0x1e8] sm:$0xf0] }
 0x115   :  { %v1476_v54 = vpop.f32.mrf.mxu3  ;;  %v3336_v4 = vor.u32 %v3601_v0, %v3333_v3  ;;  %v3301_v26 = vld [vmem:[#allocation9 + $0x1a8] sm:$0xf0] }
 0x116   :  { %v3871_v39 = vpop.f32.mrf.mxu0  ;;  %v1693_v40 = vpack.c.bf16 %v1690_v37, %v1689_v35  ;;  %2141 = vmatpush.bf16.msrb.mxu0 %v3332_v6  ;;  %v3576_v35 = vld [vmem:[#allocation9 + $0x114] sm:$0xf0]  ;;  %v3291_v37 = vld [vmem:[#allocation9 + $0x190] sm:$0xf]  ;;  %v3261_v6 = vld [vmem:[#allocation9 + $0x158] sm:$0xf0] }
 0x117   :  { %2159 = vmatpush.bf16.msra.mxu3 %v3104_v14  ;;  %2172 = vmatpush.bf16.msra.mxu1 %v3168_v18  ;;  %v3873_v56 = vpop.f32.mrf.mxu1  ;;  %v3582_v14 = vld [vmem:[#allocation9 + $0x144] sm:$0xf0]  ;;  %v3228_v54 = vor.u32 %v3576_v35, %v3227_v34  ;;  %v3264_v9 = vor.u32 %v3583_v5, %v3261_v6  ;;  %v3575_v34 = vld [vmem:[#allocation9 + $0x114] sm:$0xf]  ;;  %v3229_v35 = vld [vmem:[#allocation9 + $0x118] sm:$0xf0] }
 0x118   :  { %v1695_v33 = vunpack.c.l.bf16 %v1693_v40  ;;  %v1696_v41 = vunpack.c.h.bf16 %v1693_v40  ;;  %v3252_v16 = vor.u32 %v3582_v14, %v3251_v13  ;;  %v3592_v40 = vld [vmem:[#allocation9 + $0x194] sm:$0xf0]  ;;  %v3317_v13 = vld [vmem:[#allocation9 + $0x1c8] sm:$0xf0] }
 0x11a   :  { %v1699_v42 = vmul.f32 0.20019531, %v1695_v33  ;;  %v1700_v29 = vmul.f32 0.20019531, %v1696_v41  ;;  %2142 = vmatpush.bf16.msrb.mxu0 %v3324_v11  ;;  %2130 = vmatpush.bf16.msrb.mxu2 %v3252_v16  ;;  %v3253_v11 = vld [vmem:[#allocation9 + $0x148] sm:$0xf0] }
 0x11b   :  { %2160 = vmatpush.bf16.msra.mxu3 %v3096_v23  ;;  %2173 = vmatpush.bf16.msra.mxu1 %v3160_v36  ;;  %v3596_v23 = vld [vmem:[#allocation9 + $0x1b4] sm:$0xf0]  ;;  %v3578_v36 = vld [vmem:[#allocation9 + $0x124] sm:$0xf0] }
 0x11c   :  { %v1709_v43 = vmax.f32 %v1695_v33, %v1699_v42  ;;  %v1710_v38 = vmax.f32 %v1696_v41, %v1700_v29  ;;  %v3308_v24 = vor.u32 %v3596_v23, %v3307_v21  ;;  %v3236_v27 = vor.u32 %v3578_v36, %v3235_v50  ;;  %v3219_v42 = vld [vmem:[#allocation9 + $0x100] sm:$0xf]  ;;  %v3574_v29 = vld [vmem:[#allocation9 + $0x104] sm:$0xf0]  ;;  %v3577_v23 = vld [vmem:[#allocation9 + $0x124] sm:$0xf] }
 0x11d   :  { %v3292_v33 = vor.u32 %v3592_v40, %v3291_v37  ;;  %v3593_v36 = vld [vmem:[#allocation9 + $0x1a4] sm:$0xf] }
 0x11e   :  { %v1515_v45 = vpop.f32.mrf.mxu0  ;;  %v1713_v51 = vpack.c.bf16 %v1709_v43, %v1709_v43  ;;  %v1714_v52 = vpack.c.bf16 %v1710_v38, %v1710_v38  ;;  %2143 = vmatpush.bf16.msrb.mxu0 %v3316_v19  ;;  %2131 = vmatpush.bf16.msrb.mxu2 %v3244_v22  ;;  %v3283_v43 = vld [vmem:[#allocation9 + $0x180] sm:$0xf]  ;;  %v3590_v38 = vld [vmem:[#allocation9 + $0x184] sm:$0xf0]  ;;  %v3579_v19 = vld [vmem:[#allocation9 + $0x134] sm:$0xf] }
 0x11f   :  { %v1489_v59 = vpop.f32.mrf.mxu1  ;;  %v3220_v45 = vor.u32 %v3574_v29, %v3219_v42  ;;  %v3284_v46 = vor.u32 %v3590_v38, %v3283_v43  ;;  %v3248_v21 = vor.u32 %v3579_v19, %v3245_v63  ;;  %v3309_v22 = vld [vmem:[#allocation9 + $0x1b8] sm:$0xf0]  ;;  %v1668_v40 = vld [vmem:[#allocation1 + $0x1b] sm:$0xff]  ;;  %v3232_v38 = vor.u32 %v3575_v34, %v3229_v35 }
 0x120   :  { %v3877_v53 = vpop.f32.mrf.mxu2  ;;  %2109 = vmatmul.bf16.vlgmr.msrb.gmra.mxu3 %v1713_v51  ;;  %2122 = vmatmul.bf16.vlgmr.msrb.gmra.mxu1 %v1714_v52  ;;  %v3312_v50 = vor.u32 %v3595_v20, %v3309_v22 }
 0x121   :  { %v3875_v44 = vpop.f32.mrf.mxu3 }
 0x122   :  { %2144 = vmatpush.bf16.msrb.mxu0 %v3308_v24  ;;  %2132 = vmatpush.bf16.msrb.mxu2 %v3236_v27  ;;  %v1501_v17 = vadd.f32 %v3875_v44, %v3873_v56  ;;  %v3237_v24 = vld [vmem:[#allocation9 + $0x128] sm:$0xf0]  ;;  %v1667_v44 = vld [vmem:[#allocation1 + $0x12] sm:$0xff] }
 0x123   :  { %v3240_v56 = vor.u32 %v3577_v23, %v3237_v24 }
 0x124   :  { %v1514_v27 = vadd.f32 %v3871_v39, %v1501_v17 }
 0x126   :  { %v3879_v10 = vpop.f32.mrf.mxu0  ;;  %2145 = vmatpush.bf16.msrb.mxu0 %v3300_v30  ;;  %2133 = vmatpush.bf16.msrb.mxu2 %v3228_v54  ;;  %v3304_v30 = vor.u32 %v3593_v36, %v3301_v26  ;;  %v1527_v42 = vadd.f32 %v3877_v53, %v1514_v27 }
 0x128   :  { %v1528_v2 = vpop.f32.mrf.mxu2 }
 0x129   :  { %v1502_v62 = vpop.f32.mrf.mxu3  ;;  %v3581_v2 = vld [vmem:[#allocation9 + $0x144] sm:$0xf] }
 0x12a   :  { %2146 = vmatpush.bf16.msrb.mxu0 %v3292_v33  ;;  %2134 = vmatpush.bf16.msrb.mxu2 %v3220_v45  ;;  %v3325_v62 = vld [vmem:[#allocation9 + $0x1d8] sm:$0xf0]  ;;  %v3256_v14 = vor.u32 %v3581_v2, %v3253_v11  ;;  %v3591_v33 = vld [vmem:[#allocation9 + $0x194] sm:$0xf]  ;;  %v1678_v45 = vpack.i.b16 %v1668_v40, %v1668_v40 }
 0x12b   :  { %v3328_v48 = vor.u32 %v3599_v7, %v3325_v62 }
 0x12c   :  { %v1680_v61 = vperm.slane %v1678_v45, 0 }
 0x12e   :  { %v1567_v12 = vpop.f32.mrf.mxu0  ;;  %2147 = vmatpush.bf16.msrb.mxu0 %v3284_v46  ;;  %2179 = vmatpush.bf16.msra.mxu2 %v3280_v55  ;;  %v3285_v55 = vld [vmem:[#allocation9 + $0x188] sm:$0xf0] }
 0x12f   :  { %v3597_v12 = vld [vmem:[#allocation9 + $0x1c4] sm:$0xf] }
 0x130   :  { %2161 = vmatmul.bf16.vlgmr.msra.gmra.mxu3 %v1713_v51  ;;  %2174 = vmatmul.bf16.vlgmr.msra.gmra.mxu1 %v1714_v52  ;;  %v3603_v51 = vld [vmem:[#allocation9 + $0x1f4] sm:$0xf]  ;;  %v3320_v15 = vor.u32 %v3597_v12, %v3317_v13 }
 0x131   :  { %v3344_v59 = vor.u32 %v3603_v51, %v3341_v57 }
 0x132   :  { %2180 = vmatpush.bf16.msra.mxu2 %v3272_v1 }
 0x133   :  { %2192 = vmatpush.bf16.msra.mxu0 %v3344_v59  ;;  %v3224_v59 = vor.u32 %v3573_v47, %v3221_v49 }
 0x136   :  { %2181 = vmatpush.bf16.msra.mxu2 %v3264_v9  ;;  %v1688_v9 = vunpack.c.l.bf16 %v1680_v61 }
 0x137   :  { %v3881_v18 = vpop.f32.mrf.mxu1  ;;  %2193 = vmatpush.bf16.msra.mxu0 %v3336_v4 }
 0x13a   :  { %v3883_v25 = vpop.f32.mrf.mxu0  ;;  %2182 = vmatpush.bf16.msra.mxu2 %v3256_v14 }
 0x13b   :  { %2194 = vmatpush.bf16.msra.mxu0 %v3328_v48 }
 0x13e   :  { %2183 = vmatpush.bf16.msra.mxu2 %v3248_v21 }
 0x13f   :  { %v1541_v8 = vpop.f32.mrf.mxu1  ;;  %2195 = vmatpush.bf16.msra.mxu0 %v3320_v15 }
 0x140   :  { %v3887_v32 = vpop.f32.mrf.mxu2 }
 0x141   :  { %v3885_v31 = vpop.f32.mrf.mxu3  ;;  %v1592_v8 = vadd.f32 %v3883_v25, %v3887_v32  ;;  %v1540_v25 = vadd.f32 %v3881_v18, %v1527_v42  ;;  %v1675_v32 = vpack.i.b16 %v1667_v44, %v1667_v44 }
 0x142   :  { %v1593_v41 = vpop.f32.mrf.mxu0  ;;  %2184 = vmatpush.bf16.msra.mxu2 %v3240_v56 }
 0x143   :  { %2196 = vmatpush.bf16.msra.mxu0 %v3312_v50  ;;  %v3293_v41 = vld [vmem:[#allocation9 + $0x198] sm:$0xf0]  ;;  %v1553_v57 = vadd.f32 %v3885_v31, %v1540_v25  ;;  %v1677_v60 = vperm.slane %v1675_v32, 0 }
 0x144   :  { %v3296_v46 = vor.u32 %v3591_v33, %v3293_v41 }
 0x145   :  { %v1566_v1 = vadd.f32 %v3879_v10, %v1553_v57  ;;  %v1687_v7 = vunpack.c.l.bf16 %v1677_v60 }
 0x146   :  { %2185 = vmatpush.bf16.msra.mxu2 %v3232_v38 }
 0x147   :  { %2197 = vmatpush.bf16.msra.mxu0 %v3304_v30 }
 0x148   :  { %v1580_v58 = vpop.f32.mrf.mxu2 }
 0x149   :  { %v1554_v52 = vpop.f32.mrf.mxu3 }
 0x14a   :  { %v3589_v52 = vld [vmem:[#allocation9 + $0x184] sm:$0xf]  ;;  %2186 = vmatpush.bf16.msra.mxu2 %v3224_v59 }
 0x14b   :  { %2198 = vmatpush.bf16.msra.mxu0 %v3296_v46  ;;  %v3288_v0 = vor.u32 %v3589_v52, %v3285_v55  ;;  %v2236_v55 = vld [vmem:[%s3915_s5] sm:$0x3] }
 0x14c   :  { %v2237_v59 = vunpack.c.l.bf16 %v2236_v55 }
 0x14f   :  { %2199 = vmatpush.bf16.msra.mxu0 %v3288_v0 }
 0x157   :  { %v1604_v16 = vpop.f32.mrf.mxu1 }
 0x158   :  { %v1605_v37 = vadd.f32 %v1604_v16, %v1592_v8  ;;  %v2206_v8 = vld [vmem:[%s3914_s4] sm:$0x3] }
 0x159   :  { %v1643_v28 = vpop.f32.mrf.mxu0  ;;  %2208 = vst [vmem:[#allocation1] ss:$9 sm:$0xff] %v2206_v8 }
 0x15f   :  { %v1606_v54 = vpop.f32.mrf.mxu1 }
 0x160   :  { %v1630_v43 = vpop.f32.mrf.mxu2  ;;  %v2210_v54 = vld [vmem:[#allocation1 + $0x9] sm:$0xff] }
 0x161   :  { %v1617_v29 = vpop.f32.mrf.mxu3  ;;  %v1645_v58 = vpop.f32.mrf.mxu0  ;;  %v2214_v33 = vpack.i.b16 %v2210_v54, %v2210_v54 }
 0x162   :  { %v1618_v39 = vadd.f32 %v1617_v29, %v1605_v37  ;;  %v2209_v37 = vld [vmem:[#allocation1] sm:$0xff] }
 0x163   :  { %v2211_v40 = vpack.i.b16 %v2209_v37, %v2209_v37 }
 0x164   :  { %v1631_v51 = vadd.f32 %v1630_v43, %v1618_v39  ;;  %v2216_v43 = vperm.slane %v2214_v33, 0 }
 0x165   :  { %v2213_v39 = vperm.slane %v2211_v40, 0 }
 0x166   :  { %v1644_v53 = vadd.f32 %v1643_v28, %v1631_v51  ;;  %v2220_v47 = vunpack.c.l.bf16 %v2216_v43 }
 0x167   :  { %v1656_v18 = vpop.f32.mrf.mxu1  ;;  %v2219_v46 = vunpack.c.l.bf16 %v2213_v39 }
 0x168   :  { %v1657_v3 = vadd.f32 %v1656_v18, %v1644_v53  ;;  %v1632_v5 = vpop.f32.mrf.mxu2 }
 0x169   :  { %v1619_v4 = vpop.f32.mrf.mxu3 }
 0x16a   :  { %v1661_v6 = vpack.c.bf16 %v1657_v3, %v1566_v1  ;;  %v2239_v1 = vperm.slane %v2237_v59, 0  ;;  %v2240_v3 = vperm.slane %v2237_v59, 2 }
 0x16c   :  { %v1683_v31 = vunpack.c.l.bf16 %v1661_v6  ;;  %v1684_v62 = vunpack.c.h.bf16 %v1661_v6 }
 0x16e   :  { %v1691_v48 = vadd.f32 %v1687_v7, %v1683_v31  ;;  %v1692_v2 = vadd.f32 %v1688_v9, %v1684_v62  ;;  %v2243_v7 = vperm.slane %v2239_v1, 0  ;;  %v2244_v9 = vperm.slane %v2240_v3, 0 }
 0x16f   :  { %v1658_v11 = vpop.f32.mrf.mxu1 }
 0x170   :  { %v1694_v12 = vpack.c.bf16 %v1692_v2, %v1691_v48 }
 0x172   :  { %v1697_v13 = vunpack.c.l.bf16 %v1694_v12  ;;  %v1698_v14 = vunpack.c.h.bf16 %v1694_v12 }
 0x174   :  { %v1701_v15 = vmul.f32 0.20019531, %v1697_v13  ;;  %v1702_v16 = vmul.f32 0.20019531, %v1698_v14 }
 0x176   :  { %v1711_v17 = vmax.f32 %v1697_v13, %v1701_v15  ;;  %v1712_v10 = vmax.f32 %v1698_v14, %v1702_v16  ;;  %v2254_v14 = vstv %s3916_s6  ;;  %s3754_s6 = smov [#allocation11]  }
 0x177   :  { %s2287_s25 = sshll.u32 %s3754_s6, 4  ;;  %s2288_s25 = int_to_ptr.vmem [resolvable:$true] %s2287_s25 }
 0x178   :  { %v1715_v19 = vpack.c.bf16 %v1711_v17, %v1711_v17  ;;  %v1716_v63 = vpack.c.bf16 %v1712_v10, %v1712_v10 }
 0x17a   :  { %2135 = vmatmul.bf16.vlgmr.msrb.gmra.mxu2 %v1715_v19  ;;  %2148 = vmatmul.bf16.vlgmr.msrb.gmra.mxu0 %v1716_v63 }
 0x18a   :  { %2187 = vmatmul.bf16.vlgmr.msra.gmra.mxu2 %v1715_v19  ;;  %2200 = vmatmul.bf16.vlgmr.msra.gmra.mxu0 %v1716_v63 }
 0x19d   :  { %v2123_v20 = vpop.f32.mrf.mxu1 }
 0x1a3   :  { %v2110_v21 = vpop.f32.mrf.mxu3 }
 0x1a4   :  { %v2124_v22 = vadd.f32 %v2123_v20, %v2110_v21 }
 0x1a5   :  { %v2125_v23 = vpop.f32.mrf.mxu1 }
 0x1a6   :  { %v2276_v23 = vlaneseq }
 0x1ab   :  { %v2112_v24 = vpop.f32.mrf.mxu3 }
 0x1ad   :  { %v2175_v50 = vpop.f32.mrf.mxu1 }
 0x1b3   :  { %v2162_v36 = vpop.f32.mrf.mxu3 }
 0x1b4   :  { %v2176_v26 = vadd.f32 %v2175_v50, %v2162_v36 }
 0x1b5   :  { %v2177_v27 = vpop.f32.mrf.mxu1 }
 0x1b6   :  { %v2277_v27 = vand.u32 127, %v2276_v23 }
 0x1bb   :  { %v2164_v28 = vpop.f32.mrf.mxu3 }
 0x1f7   :  { %v2149_v56 = vpop.f32.mrf.mxu0 }
 0x1fd   :  { %v2136_v44 = vpop.f32.mrf.mxu2 }
 0x1fe   :  { %v2137_v41 = vadd.f32 %v2136_v44, %v2124_v22 }
 0x1ff   :  { %v2151_v30 = vpop.f32.mrf.mxu0 }
 0x200   :  { %v2150_v25 = vadd.f32 %v2149_v56, %v2137_v41 }
 0x205   :  { %v2138_v34 = vpop.f32.mrf.mxu2 }
 0x207   :  { %v2201_v35 = vpop.f32.mrf.mxu0 }
 0x20d   :  { %v2188_v42 = vpop.f32.mrf.mxu2 }
 0x20e   :  { %v2189_v29 = vadd.f32 %v2188_v42, %v2176_v26 }
 0x20f   :  { %v2203_v38 = vpop.f32.mrf.mxu0 }
 0x210   :  { %v2202_v32 = vadd.f32 %v2201_v35, %v2189_v29 }
 0x212   :  { %v2205_v45 = vpack.c.bf16 %v2202_v32, %v2150_v25 }
 0x214   :  { %v2217_v49 = vunpack.c.l.bf16 %v2205_v45  ;;  %v2218_v51 = vunpack.c.h.bf16 %v2205_v45 }
 0x215   :  { %v2190_v52 = vpop.f32.mrf.mxu2 }
 0x216   :  { %v2221_v57 = vadd.f32 %v2219_v46, %v2217_v49  ;;  %v2222_v58 = vadd.f32 %v2220_v47, %v2218_v51 }
 0x218   :  { %v2223_v53 = vpack.c.bf16 %v2222_v58, %v2221_v57 }
 0x21a   :  { %v2224_v60 = vunpack.c.l.bf16 %v2223_v53  ;;  %v2225_v61 = vunpack.c.h.bf16 %v2223_v53 }
 0x21c   :  { %v2226_v0 = vmul.f32 0.20019531, %v2224_v60  ;;  %v2227_v18 = vmul.f32 0.20019531, %v2225_v61 }
 0x21e   :  { %v2231_v4 = vmax.f32 %v2224_v60, %v2226_v0  ;;  %v2232_v5 = vmax.f32 %v2225_v61, %v2227_v18 }
 0x220   :  { %v2233_v6 = vpack.c.bf16 %v2232_v5, %v2231_v4 }
 0x222   :  { %v2234_v31 = vunpack.c.l.bf16 %v2233_v6  ;;  %v2235_v62 = vunpack.c.h.bf16 %v2233_v6 }
 0x224   :  { %v2245_v48 = vmul.f32 %v2243_v7, %v2234_v31  ;;  %v2246_v2 = vmul.f32 %v2244_v9, %v2235_v62 }
 0x226   :  { %v2248_v11 = vsel %vm2247_vm1, %v2245_v48, 0.0  ;;  %v2249_v12 = vsel %vm2247_vm1, %v2246_v2, 0.0 }
 0x227   :  { %v2250_v13 = vadd.f32 %v2249_v12, %v2248_v11 }
 0x229   :  { %2251 = vadd.xlane.f32.xlu0 %v2250_v13 }
 0x29c   :  { %v2252_v15 = vpop.xlane.xlu0 %2251 }
 0x29d   :  { %v2255_v16 = vadd.f32 %v2254_v14, %v2252_v15 }
 0x29f   :  { %v2256_v17 = vsub.f32 0.0, %v2255_v16 }
 0x2a1   :  { %v2257_v10 = vmul.f32 1.442695, %v2256_v17 }
 0x2a3   :  { %3614 = vpow2.f32 %v2257_v10 }
 0x2a9   :  { %v3615_v19 = vpop.eup %3614 }
 0x2aa   :  { %v2259_v63 = vadd.f32 1.0, %v3615_v19 }
 0x2ac   :  { %3616 = vrcp.f32 %v2259_v63  ;;  %v2271_v24 = vand.u32 2147483648, %v2259_v63  ;;  %v2269_v36 = vand.u32 2147483647, %v2259_v63  ;;  %vm2265_vm3 = vweird.f32 %v2259_v63 }
 0x2ae   :  { %v2272_v28 = vor.u32 1.1754944e-38, %v2271_v24  ;;  %vm2270_vm5 = vcmp.eq.f32.partialorder %v2269_v36, 8.507059e+37 }
 0x2b2   :  { %v3617_v20 = vpop.eup %3616 }
 0x2b3   :  { %v2261_v21 = vmul.f32 %v3617_v20, %v2259_v63  ;;  %vm2266_vm2 = vweird.f32 %v3617_v20 }
 0x2b4   :  { %vm2267_vm4 = vmor %vm2265_vm3, %vm2266_vm2 }
 0x2b5   :  { %v2262_v22 = vsub.f32 1.0, %v2261_v21 }
 0x2b7   :  { %v2263_v50 = vmul.f32 %v3617_v20, %v2262_v22 }
 0x2b9   :  { %v2264_v26 = vadd.f32 %v3617_v20, %v2263_v50 }
 0x2bb   :  { %v2268_v8 = vsel %vm2267_vm4, %v3617_v20, %v2264_v26 }
 0x2bc   :  { %v2273_v56 = vsel %vm2270_vm5, %v2272_v28, %v2268_v8 }
 0x2bd   :  { %v2278_v44 = vperm.slane %v2273_v56, %v2277_v27 }
 0x2bf   :  { %2281 = vst.msk [vmem:[#allocation11] sm:$0x1] %vm2280_vm6, %v2278_v44 }
 0x2c0   :  { %2292 = dma.vmem_to_hbm [thread:$0]  %s2288_s25, 16, %s2290_s28, [#allocation5]  }
 0x2c1   :  { %3744 = dma.done.wait [#allocation5], 16  }
 0x2c2   :  { %3745 = vsyncadd [#allocation5], 4294967280 }
 0x2c3   :  { %2297 = vsyncpa [#allocation4], 1 }
 0x2c4   :  { %2298 = vsyncpa [#allocation7], 1 }
 0x2c5   :  { %2299 = vsyncpa [#allocation10], 1 }
 0x2c6   :  { %2300 = vsyncpa [#allocation5], 1 }

</bundles_post_ra>
